<compile_context>
chip_gen: v6e
topology: v6e:2x2x1
jax: 0.10.0
libtpu: 0.0.40
codegen_flags: <defaults>
</compile_context>

<pallas_src>
from functools import partial

import jax
import jax.numpy as jnp
from jax.experimental import pallas as pl
from jax.experimental.pallas import tpu as pltpu


def mha_kernel(x_ref, gamma_ref, beta_ref, wqkv_ref, bqkv_ref, wo_ref, bo_ref, o_ref,
               *, num_heads, eps, compute_dtype):
    Bt, S, E = x_ref.shape
    H = num_heads
    D = E // H
    M = Bt * S
    cdtype = compute_dtype          # MXU operand dtype (input dtype, or bf16 when requested)

    # ---- LayerNorm over E on flattened rows (f32 statistics, PyTorch eps=1e-5) ----
    x = x_ref[...].astype(jnp.float32).reshape(M, E)
    mean = jnp.mean(x, axis=-1, keepdims=True)
    xc = x - mean
    var = jnp.mean(xc * xc, axis=-1, keepdims=True)
    xn = (xc * jax.lax.rsqrt(var + eps) * gamma_ref[...] + beta_ref[...]).astype(cdtype)  # (M, E)

    # f32 output accumulator; the head merge is fused into the per-head out-proj accumulation.
    acc = jnp.zeros((M, E), jnp.float32)

    # ---- per-head attention.  The head split happens through the per-head weight layout
    #      (leading-axis indexing of the (3, H, E, D) stack is free), so there are no lane-dim
    #      reshapes / swapaxes of activations.  1/sqrt(D) is pre-folded into Wq / bq. ----
    # Note: with D < 128 the attention contractions underfill the MXU depth; that is inherent to
    # the head size, so Bt is sized for the projections instead (see _pick_block_b).
    for h in range(H):              # static unroll; H is small (12 in the reference module)
        q = (jnp.dot(xn, wqkv_ref[0, h], preferred_element_type=jnp.float32)
             + bqkv_ref[0, h]).astype(cdtype).reshape(Bt, S, D)
        k = (jnp.dot(xn, wqkv_ref[1, h], preferred_element_type=jnp.float32)
             + bqkv_ref[1, h]).astype(cdtype).reshape(Bt, S, D)
        v = (jnp.dot(xn, wqkv_ref[2, h], preferred_element_type=jnp.float32)
             + bqkv_ref[2, h]).astype(cdtype).reshape(Bt, S, D)

        s = jnp.einsum("bqd,bkd->bqk", q, k, preferred_element_type=jnp.float32)   # (Bt, S, S)
        s = s - jnp.max(s, axis=-1, keepdims=True)
        p = jnp.exp(s)
        row_sum = jnp.sum(p, axis=-1, keepdims=True)                               # (Bt, S, 1)
        a = jnp.einsum("bqk,bkd->bqd", p.astype(cdtype), v,
                       preferred_element_type=jnp.float32)                         # (Bt, S, D)
        # Exact softmax normalization AFTER the PV matmul (S*D elementwise work instead of S*S);
        # approx reciprocal is intentionally NOT used to keep parity with PyTorch softmax.
        a = (a * (1.0 / row_sum)).astype(cdtype).reshape(M, D)
        acc = acc + jnp.dot(a, wo_ref[h], preferred_element_type=jnp.float32)      # head merge

    o_ref[...] = (acc + bo_ref[...]).reshape(Bt, S, E).astype(o_ref.dtype)


def _per_batch_vmem_bytes(S, E, H, in_bytes, c_bytes):
    D = E // H
    return (S * E * (8 + c_bytes)          # x_f32 + acc_f32 + xn
            + 4 * S * E * in_bytes         # double-buffered input + output tiles
            + 3 * S * D * (4 + c_bytes)    # q/k/v (f32 matmul result + cdtype copy), one head live
            + 2 * S * S * 4                # scores + probs (f32)
            + 2 * S * D * 4)               # PV result + normalized copy


def _pick_block_b(B, S, E, H, in_bytes, c_bytes, batch_budget_bytes, target_rows=512):
    per_b = _per_batch_vmem_bytes(S, E, H, in_bytes, c_bytes)
    bt_mem = max(1, batch_budget_bytes // max(per_b, 1))
    bt_occ = max(1, -(-target_rows // S))        # ceil(target_rows / S): MXU M-dim occupancy target
    bt = min(B, bt_occ, bt_mem)
    if B >= 2:
        bt = min(bt, max(1, B // 2))             # keep >= 2 grid steps so both v7x TCs get work
    while B % bt:                                # keep the grid exact
        bt -= 1
    return bt


def multi_head_attention(x, params, *, num_heads, eps=1e-5, mxu_dtype=None, block_b=None):
    B, S, E = x.shape
    H = num_heads
    assert E % H == 0, "embedding_dim must be divisible by num_heads"
    D = E // H
    in_dtype = x.dtype
    c_dtype = jnp.dtype(in_dtype if mxu_dtype is None else mxu_dtype)
    in_bytes = jnp.dtype(in_dtype).itemsize
    c_bytes = c_dtype.itemsize

    # ---- host-side weight prep (PyTorch convention: y = x @ W.T + b), per-head pre-split ----
    w_in = jnp.asarray(params["in_proj_weight"], jnp.float32)           # (3E, E), rows = [q; k; v]
    b_in = jnp.asarray(params["in_proj_bias"], jnp.float32)             # (3E,)
    scale = 1.0 / (D ** 0.5)
    wq = jnp.transpose(w_in[:E].reshape(H, D, E), (0, 2, 1)) * scale    # fold 1/sqrt(D) into Q
    wk = jnp.transpose(w_in[E:2 * E].reshape(H, D, E), (0, 2, 1))
    wv = jnp.transpose(w_in[2 * E:].reshape(H, D, E), (0, 2, 1))
    wqkv = jnp.stack([wq, wk, wv]).astype(c_dtype)                      # (3, H, E, D)
    bq = b_in[:E].reshape(H, 1, D) * scale
    bk = b_in[E:2 * E].reshape(H, 1, D)
    bv = b_in[2 * E:].reshape(H, 1, D)
    bqkv = jnp.stack([bq, bk, bv]).astype(jnp.float32)                  # (3, H, 1, D)
    wo_h = jnp.asarray(params["out_proj_weight"], jnp.float32).T.reshape(H, D, E).astype(c_dtype)
    bo = jnp.asarray(params["out_proj_bias"], jnp.float32).reshape(1, E)
    gamma = jnp.asarray(params["ln_gamma"], jnp.float32).reshape(1, E)
    beta = jnp.asarray(params["ln_beta"], jnp.float32).reshape(1, E)

    # ---- generation-aware VMEM budget (v7x 64 MiB, v5e/v6e 128 MiB); fall back conservatively ----
    try:
        vmem_cap = int(pltpu.get_tpu_info().vmem_capacity_bytes)
    except Exception:  # no TPU info available (e.g. interpret mode on a non-TPU host)
        vmem_cap = 64 * 1024 * 1024
    usable = (vmem_cap // 8) * 7                                        # leave ~12.5% headroom

    w_bytes = (wqkv.size + wo_h.size) * c_dtype.itemsize
    const_bytes = (bqkv.size + bo.size + gamma.size + beta.size) * 4
    batch_budget = max(1, usable // 2 - 2 * (w_bytes + const_bytes))    # weights are double-buffered

    if block_b is None:
        block_b = _pick_block_b(B, S, E, H, in_bytes, c_bytes, batch_budget)
    Bt = block_b
    assert B % Bt == 0
    grid = (B // Bt,)

    vmem_need = (Bt * _per_batch_vmem_bytes(S, E, H, in_bytes, c_bytes)
                 + 2 * (w_bytes + const_bytes))
    # Always pass an explicit limit (v5e's scoped default is only 16 MiB), capped below physical.
    vmem_limit = int(min(usable, max(32 * 1024 * 1024, vmem_need * 5 // 4)))

    # ---- advisory cost estimate so XLA can schedule around this call ----
    flops = (2 * B * S * E * 3 * E          # QKV projections
             + 2 * B * S * E * E            # output projection
             + 4 * B * H * S * S * D        # QK^T and PV
             + 12 * B * S * E)              # LayerNorm / bias / softmax VPU work
    transcendentals = B * H * S * S + B * S
    bytes_accessed = 2 * B * S * E * in_bytes + w_bytes + const_bytes
    cost = pl.CostEstimate(flops=int(flops), transcendentals=int(transcendentals),
                           bytes_accessed=int(bytes_accessed))

    kernel = partial(mha_kernel, num_heads=H, eps=eps, compute_dtype=c_dtype)
    return pl.pallas_call(
        kernel,
        out_shape=jax.ShapeDtypeStruct((B, S, E), in_dtype),
        grid_spec=pltpu.PrefetchScalarGridSpec(
            num_scalar_prefetch=0,
            grid=grid,
            in_specs=[
                pl.BlockSpec((Bt, S, E), lambda b: (b, 0, 0)),          # x
                pl.BlockSpec((1, E), lambda b: (0, 0)),                 # LayerNorm gamma
                pl.BlockSpec((1, E), lambda b: (0, 0)),                 # LayerNorm beta
                pl.BlockSpec((3, H, E, D), lambda b: (0, 0, 0, 0)),     # per-head Wq*scale, Wk, Wv
                pl.BlockSpec((3, H, 1, D), lambda b: (0, 0, 0, 0)),     # per-head bq*scale, bk, bv
                pl.BlockSpec((H, D, E), lambda b: (0, 0, 0)),           # per-head W_out^T rows
                pl.BlockSpec((1, E), lambda b: (0, 0)),                 # b_out
            ],
            out_specs=pl.BlockSpec((Bt, S, E), lambda b: (b, 0, 0)),
        ),
        compiler_params=pltpu.CompilerParams(
            dimension_semantics=("parallel",),
            vmem_limit_bytes=vmem_limit,
        ),
        cost_estimate=cost,
    )(x, gamma, beta, wqkv, bqkv, wo_h, bo)


def reference_mha(x, params, *, num_heads, eps=1e-5):
    # Pure-JAX reference mirroring PyTorch semantics (for the correctness check).
    B, S, E = x.shape
    D = E // num_heads
    mean = jnp.mean(x, axis=-1, keepdims=True)
    var = jnp.mean((x - mean) ** 2, axis=-1, keepdims=True)
    xn = (x - mean) / jnp.sqrt(var + eps) * params["ln_gamma"] + params["ln_beta"]
    qkv = xn @ params["in_proj_weight"].T + params["in_proj_bias"]
    q, k, v = jnp.split(qkv, 3, axis=-1)

    def heads(t):  # (B,S,E) -> (B,H,S,D)
        return t.reshape(B, S, num_heads, D).transpose(0, 2, 1, 3)

    qh, kh, vh = heads(q), heads(k), heads(v)
    s = jnp.einsum("bhqd,bhkd->bhqk", qh, kh) / (D ** 0.5)
    p = jax.nn.softmax(s, axis=-1)
    o = jnp.einsum("bhqk,bhkd->bhqd", p, vh)
    o = o.transpose(0, 2, 1, 3).reshape(B, S, E)
    return o @ params["out_proj_weight"].T + params["out_proj_bias"]


if __name__ == "__main__":
    # Scaled-down MultiHeadAttention: embedding_dim=128 (lane-dense output), 4 heads (D=32).
    B, S, E, H = 2, 8, 128, 4

    key = jax.random.PRNGKey(0)
    kx, kw1, kb1, kw2, kb2 = jax.random.split(key, 5)

    x = jax.random.normal(kx, (B, S, E), dtype=jnp.float32)

    params = {
        # LayerNorm defaults: gamma=1, beta=0
        "ln_gamma": jnp.ones((E,), dtype=jnp.float32),
        "ln_beta": jnp.zeros((E,), dtype=jnp.float32),
        # Deterministic synthetic weights (xavier-ish scale)
        "in_proj_weight": jax.random.normal(kw1, (3 * E, E), dtype=jnp.float32) * (1.0 / E ** 0.5),
        "in_proj_bias": jax.random.normal(kb1, (3 * E,), dtype=jnp.float32) * 0.02,
        "out_proj_weight": jax.random.normal(kw2, (E, E), dtype=jnp.float32) * (1.0 / E ** 0.5),
        "out_proj_bias": jax.random.normal(kb2, (E,), dtype=jnp.float32) * 0.02,
    }

    # High-precision reference (avoids any default bf16 matmul downcast on TPU).
    with jax.default_matmul_precision("highest"):
        ref = reference_mha(x, params, num_heads=H)

    # 1) Exact-dtype path (f32 MXU operands): tight tolerance.
    out = jax.block_until_ready(multi_head_attention(x, params, num_heads=H))
    assert out.shape == (B, S, E)
    assert jnp.allclose(out, ref, atol=2e-3, rtol=2e-3), "mismatch vs reference (f32 path)"

    # 2) bf16-MXU path (perf review item: bf16 operands, f32 accumulation): loose tolerance
    #    that absorbs bf16 operand rounding.
    out_bf16 = jax.block_until_ready(
        multi_head_attention(x, params, num_heads=H, mxu_dtype=jnp.bfloat16))
    assert jnp.allclose(out_bf16, ref, atol=5e-2, rtol=5e-2), "mismatch vs reference (bf16 path)"

    print("KERNEL_OK")
</pallas_src>

<mosaic_0001>
module attributes {stable_mosaic.version = 11 : i64} {
  func.func @mha_kernel(%arg0: i32, %arg1: memref<1x8x128xf32, #tpu.memory_space<vmem>>, %arg2: memref<1x128xf32, #tpu.memory_space<vmem>>, %arg3: memref<1x128xf32, #tpu.memory_space<vmem>>, %arg4: memref<3x4x128x32xf32, #tpu.memory_space<vmem>>, %arg5: memref<3x4x1x32xf32, #tpu.memory_space<vmem>>, %arg6: memref<4x32x128xf32, #tpu.memory_space<vmem>>, %arg7: memref<1x128xf32, #tpu.memory_space<vmem>>, %arg8: memref<1x8x128xf32, #tpu.memory_space<vmem>>) attributes {dimension_semantics = [#tpu.dimension_semantics<parallel>], iteration_bounds = array<i64: 2>, scalar_prefetch = 0 : i64, scratch_operands = 0 : i64, tpu.core_type = #tpu.core_type<tc>, window_params = [{transform_indices = @transform_0, window_bounds = array<i64: 1, 8, 128>}, {pipeline_mode = #tpu.pipeline_mode<synchronous>, transform_indices = @transform_1, window_bounds = array<i64: 1, 128>}, {pipeline_mode = #tpu.pipeline_mode<synchronous>, transform_indices = @transform_2, window_bounds = array<i64: 1, 128>}, {pipeline_mode = #tpu.pipeline_mode<synchronous>, transform_indices = @transform_3, window_bounds = array<i64: 3, 4, 128, 32>}, {pipeline_mode = #tpu.pipeline_mode<synchronous>, transform_indices = @transform_4, window_bounds = array<i64: 3, 4, 1, 32>}, {pipeline_mode = #tpu.pipeline_mode<synchronous>, transform_indices = @transform_5, window_bounds = array<i64: 4, 32, 128>}, {pipeline_mode = #tpu.pipeline_mode<synchronous>, transform_indices = @transform_6, window_bounds = array<i64: 1, 128>}, {transform_indices = @transform_7, window_bounds = array<i64: 1, 8, 128>}]} {
    %c0 = arith.constant 0 : index
    %c0_0 = arith.constant 0 : index
    %c0_1 = arith.constant 0 : index
    %0 = vector.load %arg1[%c0, %c0_0, %c0_1] : memref<1x8x128xf32, #tpu.memory_space<vmem>>, vector<1x8x128xf32>
    %1 = vector.shape_cast %0 : vector<1x8x128xf32> to vector<8x128xf32>
    %cst = arith.constant dense<0.000000e+00> : vector<8xf32>
    %2 = vector.multi_reduction <add>, %1, %cst [1] : vector<8x128xf32> to vector<8xf32>
    %3 = vector.shape_cast %2 : vector<8xf32> to vector<8x1xf32>
    %cst_2 = arith.constant 1.280000e+02 : f32
    %4 = vector.broadcast %cst_2 : f32 to vector<8x1xf32>
    %5 = arith.divf %3, %4 : vector<8x1xf32>
    %6 = vector.broadcast %5 : vector<8x1xf32> to vector<8x128xf32>
    %7 = arith.subf %1, %6 : vector<8x128xf32>
    %8 = arith.mulf %7, %7 : vector<8x128xf32>
    %cst_3 = arith.constant dense<0.000000e+00> : vector<8xf32>
    %9 = vector.multi_reduction <add>, %8, %cst_3 [1] : vector<8x128xf32> to vector<8xf32>
    %10 = vector.shape_cast %9 : vector<8xf32> to vector<8x1xf32>
    %cst_4 = arith.constant 1.280000e+02 : f32
    %11 = vector.broadcast %cst_4 : f32 to vector<8x1xf32>
    %12 = arith.divf %10, %11 : vector<8x1xf32>
    %cst_5 = arith.constant 9.99999974E-6 : f32
    %13 = vector.broadcast %cst_5 : f32 to vector<8x1xf32>
    %14 = arith.addf %12, %13 : vector<8x1xf32>
    %15 = math.rsqrt %14 : vector<8x1xf32>
    %16 = vector.broadcast %15 : vector<8x1xf32> to vector<8x128xf32>
    %17 = arith.mulf %7, %16 : vector<8x128xf32>
    %c0_6 = arith.constant 0 : index
    %c0_7 = arith.constant 0 : index
    %18 = vector.load %arg2[%c0_6, %c0_7] : memref<1x128xf32, #tpu.memory_space<vmem>>, vector<1x128xf32>
    %19 = vector.broadcast %18 : vector<1x128xf32> to vector<8x128xf32>
    %20 = arith.mulf %17, %19 : vector<8x128xf32>
    %c0_8 = arith.constant 0 : index
    %c0_9 = arith.constant 0 : index
    %21 = vector.load %arg3[%c0_8, %c0_9] : memref<1x128xf32, #tpu.memory_space<vmem>>, vector<1x128xf32>
    %22 = vector.broadcast %21 : vector<1x128xf32> to vector<8x128xf32>
    %23 = arith.addf %20, %22 : vector<8x128xf32>
    %cst_10 = arith.constant 0.000000e+00 : f32
    %24 = vector.broadcast %cst_10 : f32 to vector<8x128xf32>
    %c0_11 = arith.constant 0 : index
    %c0_12 = arith.constant 0 : index
    %c0_13 = arith.constant 0 : index
    %c0_14 = arith.constant 0 : index
    %25 = vector.load %arg4[%c0_11, %c0_12, %c0_13, %c0_14] : memref<3x4x128x32xf32, #tpu.memory_space<vmem>>, vector<1x1x128x32xf32>
    %26 = vector.shape_cast %25 : vector<1x1x128x32xf32> to vector<128x32xf32>
    %cst_15 = arith.constant dense<0.000000e+00> : vector<8x32xf32>
    %27 = tpu.matmul %23, %26, %cst_15 {dimension_numbers = #tpu.dot_dimension_numbers<[1], [0], [0], [1], [0, 0, 1, 1], [], []>} : vector<8x128xf32>, vector<128x32xf32>, vector<8x32xf32> -> vector<8x32xf32>
    %c0_16 = arith.constant 0 : index
    %c0_17 = arith.constant 0 : index
    %c0_18 = arith.constant 0 : index
    %c0_19 = arith.constant 0 : index
    %28 = vector.load %arg5[%c0_16, %c0_17, %c0_18, %c0_19] : memref<3x4x1x32xf32, #tpu.memory_space<vmem>>, vector<1x1x1x32xf32>
    %29 = vector.shape_cast %28 : vector<1x1x1x32xf32> to vector<1x32xf32>
    %30 = vector.broadcast %29 : vector<1x32xf32> to vector<8x32xf32>
    %31 = arith.addf %27, %30 : vector<8x32xf32>
    %32 = vector.shape_cast %31 : vector<8x32xf32> to vector<1x8x32xf32>
    %c1 = arith.constant 1 : index
    %c0_20 = arith.constant 0 : index
    %c0_21 = arith.constant 0 : index
    %c0_22 = arith.constant 0 : index
    %33 = vector.load %arg4[%c1, %c0_20, %c0_21, %c0_22] : memref<3x4x128x32xf32, #tpu.memory_space<vmem>>, vector<1x1x128x32xf32>
    %34 = vector.shape_cast %33 : vector<1x1x128x32xf32> to vector<128x32xf32>
    %cst_23 = arith.constant dense<0.000000e+00> : vector<8x32xf32>
    %35 = tpu.matmul %23, %34, %cst_23 {dimension_numbers = #tpu.dot_dimension_numbers<[1], [0], [0], [1], [0, 0, 1, 1], [], []>} : vector<8x128xf32>, vector<128x32xf32>, vector<8x32xf32> -> vector<8x32xf32>
    %c1_24 = arith.constant 1 : index
    %c0_25 = arith.constant 0 : index
    %c0_26 = arith.constant 0 : index
    %c0_27 = arith.constant 0 : index
    %36 = vector.load %arg5[%c1_24, %c0_25, %c0_26, %c0_27] : memref<3x4x1x32xf32, #tpu.memory_space<vmem>>, vector<1x1x1x32xf32>
    %37 = vector.shape_cast %36 : vector<1x1x1x32xf32> to vector<1x32xf32>
    %38 = vector.broadcast %37 : vector<1x32xf32> to vector<8x32xf32>
    %39 = arith.addf %35, %38 : vector<8x32xf32>
    %40 = vector.shape_cast %39 : vector<8x32xf32> to vector<1x8x32xf32>
    %c2 = arith.constant 2 : index
    %c0_28 = arith.constant 0 : index
    %c0_29 = arith.constant 0 : index
    %c0_30 = arith.constant 0 : index
    %41 = vector.load %arg4[%c2, %c0_28, %c0_29, %c0_30] : memref<3x4x128x32xf32, #tpu.memory_space<vmem>>, vector<1x1x128x32xf32>
    %42 = vector.shape_cast %41 : vector<1x1x128x32xf32> to vector<128x32xf32>
    %cst_31 = arith.constant dense<0.000000e+00> : vector<8x32xf32>
    %43 = tpu.matmul %23, %42, %cst_31 {dimension_numbers = #tpu.dot_dimension_numbers<[1], [0], [0], [1], [0, 0, 1, 1], [], []>} : vector<8x128xf32>, vector<128x32xf32>, vector<8x32xf32> -> vector<8x32xf32>
    %c2_32 = arith.constant 2 : index
    %c0_33 = arith.constant 0 : index
    %c0_34 = arith.constant 0 : index
    %c0_35 = arith.constant 0 : index
    %44 = vector.load %arg5[%c2_32, %c0_33, %c0_34, %c0_35] : memref<3x4x1x32xf32, #tpu.memory_space<vmem>>, vector<1x1x1x32xf32>
    %45 = vector.shape_cast %44 : vector<1x1x1x32xf32> to vector<1x32xf32>
    %46 = vector.broadcast %45 : vector<1x32xf32> to vector<8x32xf32>
    %47 = arith.addf %43, %46 : vector<8x32xf32>
    %48 = vector.shape_cast %47 : vector<8x32xf32> to vector<1x8x32xf32>
    "tpu.trace_start"() <{level = 10 : i32, message = "bqd,bkd->bqk"}> : () -> ()
    %cst_36 = arith.constant dense<0.000000e+00> : vector<1x8x8xf32>
    %49 = tpu.matmul %32, %40, %cst_36 {dimension_numbers = #tpu.dot_dimension_numbers<[2], [2], [1], [1], [0, 0, 0, 1, 1, 1], [0], [0]>} : vector<1x8x32xf32>, vector<1x8x32xf32>, vector<1x8x8xf32> -> vector<1x8x8xf32>
    "tpu.trace_stop"() : () -> ()
    %cst_37 = arith.constant dense<0xFF800000> : vector<1x8xf32>
    %50 = vector.multi_reduction <maximumf>, %49, %cst_37 [2] : vector<1x8x8xf32> to vector<1x8xf32>
    %51 = vector.shape_cast %50 : vector<1x8xf32> to vector<1x8x1xf32>
    %52 = vector.broadcast %51 : vector<1x8x1xf32> to vector<1x8x8xf32>
    %53 = arith.subf %49, %52 : vector<1x8x8xf32>
    %54 = math.exp %53 : vector<1x8x8xf32>
    %cst_38 = arith.constant dense<0.000000e+00> : vector<1x8xf32>
    %55 = vector.multi_reduction <add>, %54, %cst_38 [2] : vector<1x8x8xf32> to vector<1x8xf32>
    %56 = vector.shape_cast %55 : vector<1x8xf32> to vector<1x8x1xf32>
    "tpu.trace_start"() <{level = 10 : i32, message = "bqk,bkd->bqd"}> : () -> ()
    %cst_39 = arith.constant dense<0.000000e+00> : vector<1x8x32xf32>
    %57 = tpu.matmul %54, %48, %cst_39 {dimension_numbers = #tpu.dot_dimension_numbers<[2], [1], [1], [2], [0, 0, 0, 1, 1, 2], [0], [0]>} : vector<1x8x8xf32>, vector<1x8x32xf32>, vector<1x8x32xf32> -> vector<1x8x32xf32>
    "tpu.trace_stop"() : () -> ()
    %cst_40 = arith.constant 1.000000e+00 : f32
    %58 = vector.broadcast %cst_40 : f32 to vector<1x8x1xf32>
    %59 = arith.divf %58, %56 : vector<1x8x1xf32>
    %60 = vector.broadcast %59 : vector<1x8x1xf32> to vector<1x8x32xf32>
    %61 = arith.mulf %57, %60 : vector<1x8x32xf32>
    %62 = vector.shape_cast %61 : vector<1x8x32xf32> to vector<8x32xf32>
    %c0_41 = arith.constant 0 : index
    %c0_42 = arith.constant 0 : index
    %c0_43 = arith.constant 0 : index
    %63 = vector.load %arg6[%c0_41, %c0_42, %c0_43] : memref<4x32x128xf32, #tpu.memory_space<vmem>>, vector<1x32x128xf32>
    %64 = vector.shape_cast %63 : vector<1x32x128xf32> to vector<32x128xf32>
    %cst_44 = arith.constant dense<0.000000e+00> : vector<8x128xf32>
    %65 = tpu.matmul %62, %64, %cst_44 {dimension_numbers = #tpu.dot_dimension_numbers<[1], [0], [0], [1], [0, 0, 1, 1], [], []>} : vector<8x32xf32>, vector<32x128xf32>, vector<8x128xf32> -> vector<8x128xf32>
    %66 = arith.addf %24, %65 : vector<8x128xf32>
    %c0_45 = arith.constant 0 : index
    %c1_46 = arith.constant 1 : index
    %c0_47 = arith.constant 0 : index
    %c0_48 = arith.constant 0 : index
    %67 = vector.load %arg4[%c0_45, %c1_46, %c0_47, %c0_48] : memref<3x4x128x32xf32, #tpu.memory_space<vmem>>, vector<1x1x128x32xf32>
    %68 = vector.shape_cast %67 : vector<1x1x128x32xf32> to vector<128x32xf32>
    %cst_49 = arith.constant dense<0.000000e+00> : vector<8x32xf32>
    %69 = tpu.matmul %23, %68, %cst_49 {dimension_numbers = #tpu.dot_dimension_numbers<[1], [0], [0], [1], [0, 0, 1, 1], [], []>} : vector<8x128xf32>, vector<128x32xf32>, vector<8x32xf32> -> vector<8x32xf32>
    %c0_50 = arith.constant 0 : index
    %c1_51 = arith.constant 1 : index
    %c0_52 = arith.constant 0 : index
    %c0_53 = arith.constant 0 : index
    %70 = vector.load %arg5[%c0_50, %c1_51, %c0_52, %c0_53] : memref<3x4x1x32xf32, #tpu.memory_space<vmem>>, vector<1x1x1x32xf32>
    %71 = vector.shape_cast %70 : vector<1x1x1x32xf32> to vector<1x32xf32>
    %72 = vector.broadcast %71 : vector<1x32xf32> to vector<8x32xf32>
    %73 = arith.addf %69, %72 : vector<8x32xf32>
    %74 = vector.shape_cast %73 : vector<8x32xf32> to vector<1x8x32xf32>
    %c1_54 = arith.constant 1 : index
    %c1_55 = arith.constant 1 : index
    %c0_56 = arith.constant 0 : index
    %c0_57 = arith.constant 0 : index
    %75 = vector.load %arg4[%c1_54, %c1_55, %c0_56, %c0_57] : memref<3x4x128x32xf32, #tpu.memory_space<vmem>>, vector<1x1x128x32xf32>
    %76 = vector.shape_cast %75 : vector<1x1x128x32xf32> to vector<128x32xf32>
    %cst_58 = arith.constant dense<0.000000e+00> : vector<8x32xf32>
    %77 = tpu.matmul %23, %76, %cst_58 {dimension_numbers = #tpu.dot_dimension_numbers<[1], [0], [0], [1], [0, 0, 1, 1], [], []>} : vector<8x128xf32>, vector<128x32xf32>, vector<8x32xf32> -> vector<8x32xf32>
    %c1_59 = arith.constant 1 : index
    %c1_60 = arith.constant 1 : index
    %c0_61 = arith.constant 0 : index
    %c0_62 = arith.constant 0 : index
    %78 = vector.load %arg5[%c1_59, %c1_60, %c0_61, %c0_62] : memref<3x4x1x32xf32, #tpu.memory_space<vmem>>, vector<1x1x1x32xf32>
    %79 = vector.shape_cast %78 : vector<1x1x1x32xf32> to vector<1x32xf32>
    %80 = vector.broadcast %79 : vector<1x32xf32> to vector<8x32xf32>
    %81 = arith.addf %77, %80 : vector<8x32xf32>
    %82 = vector.shape_cast %81 : vector<8x32xf32> to vector<1x8x32xf32>
    %c2_63 = arith.constant 2 : index
    %c1_64 = arith.constant 1 : index
    %c0_65 = arith.constant 0 : index
    %c0_66 = arith.constant 0 : index
    %83 = vector.load %arg4[%c2_63, %c1_64, %c0_65, %c0_66] : memref<3x4x128x32xf32, #tpu.memory_space<vmem>>, vector<1x1x128x32xf32>
    %84 = vector.shape_cast %83 : vector<1x1x128x32xf32> to vector<128x32xf32>
    %cst_67 = arith.constant dense<0.000000e+00> : vector<8x32xf32>
    %85 = tpu.matmul %23, %84, %cst_67 {dimension_numbers = #tpu.dot_dimension_numbers<[1], [0], [0], [1], [0, 0, 1, 1], [], []>} : vector<8x128xf32>, vector<128x32xf32>, vector<8x32xf32> -> vector<8x32xf32>
    %c2_68 = arith.constant 2 : index
    %c1_69 = arith.constant 1 : index
    %c0_70 = arith.constant 0 : index
    %c0_71 = arith.constant 0 : index
    %86 = vector.load %arg5[%c2_68, %c1_69, %c0_70, %c0_71] : memref<3x4x1x32xf32, #tpu.memory_space<vmem>>, vector<1x1x1x32xf32>
    %87 = vector.shape_cast %86 : vector<1x1x1x32xf32> to vector<1x32xf32>
    %88 = vector.broadcast %87 : vector<1x32xf32> to vector<8x32xf32>
    %89 = arith.addf %85, %88 : vector<8x32xf32>
    %90 = vector.shape_cast %89 : vector<8x32xf32> to vector<1x8x32xf32>
    "tpu.trace_start"() <{level = 10 : i32, message = "bqd,bkd->bqk"}> : () -> ()
    %cst_72 = arith.constant dense<0.000000e+00> : vector<1x8x8xf32>
    %91 = tpu.matmul %74, %82, %cst_72 {dimension_numbers = #tpu.dot_dimension_numbers<[2], [2], [1], [1], [0, 0, 0, 1, 1, 1], [0], [0]>} : vector<1x8x32xf32>, vector<1x8x32xf32>, vector<1x8x8xf32> -> vector<1x8x8xf32>
    "tpu.trace_stop"() : () -> ()
    %cst_73 = arith.constant dense<0xFF800000> : vector<1x8xf32>
    %92 = vector.multi_reduction <maximumf>, %91, %cst_73 [2] : vector<1x8x8xf32> to vector<1x8xf32>
    %93 = vector.shape_cast %92 : vector<1x8xf32> to vector<1x8x1xf32>
    %94 = vector.broadcast %93 : vector<1x8x1xf32> to vector<1x8x8xf32>
    %95 = arith.subf %91, %94 : vector<1x8x8xf32>
    %96 = math.exp %95 : vector<1x8x8xf32>
    %cst_74 = arith.constant dense<0.000000e+00> : vector<1x8xf32>
    %97 = vector.multi_reduction <add>, %96, %cst_74 [2] : vector<1x8x8xf32> to vector<1x8xf32>
    %98 = vector.shape_cast %97 : vector<1x8xf32> to vector<1x8x1xf32>
    "tpu.trace_start"() <{level = 10 : i32, message = "bqk,bkd->bqd"}> : () -> ()
    %cst_75 = arith.constant dense<0.000000e+00> : vector<1x8x32xf32>
    %99 = tpu.matmul %96, %90, %cst_75 {dimension_numbers = #tpu.dot_dimension_numbers<[2], [1], [1], [2], [0, 0, 0, 1, 1, 2], [0], [0]>} : vector<1x8x8xf32>, vector<1x8x32xf32>, vector<1x8x32xf32> -> vector<1x8x32xf32>
    "tpu.trace_stop"() : () -> ()
    %cst_76 = arith.constant 1.000000e+00 : f32
    %100 = vector.broadcast %cst_76 : f32 to vector<1x8x1xf32>
    %101 = arith.divf %100, %98 : vector<1x8x1xf32>
    %102 = vector.broadcast %101 : vector<1x8x1xf32> to vector<1x8x32xf32>
    %103 = arith.mulf %99, %102 : vector<1x8x32xf32>
    %104 = vector.shape_cast %103 : vector<1x8x32xf32> to vector<8x32xf32>
    %c1_77 = arith.constant 1 : index
    %c0_78 = arith.constant 0 : index
    %c0_79 = arith.constant 0 : index
    %105 = vector.load %arg6[%c1_77, %c0_78, %c0_79] : memref<4x32x128xf32, #tpu.memory_space<vmem>>, vector<1x32x128xf32>
    %106 = vector.shape_cast %105 : vector<1x32x128xf32> to vector<32x128xf32>
    %cst_80 = arith.constant dense<0.000000e+00> : vector<8x128xf32>
    %107 = tpu.matmul %104, %106, %cst_80 {dimension_numbers = #tpu.dot_dimension_numbers<[1], [0], [0], [1], [0, 0, 1, 1], [], []>} : vector<8x32xf32>, vector<32x128xf32>, vector<8x128xf32> -> vector<8x128xf32>
    %108 = arith.addf %66, %107 : vector<8x128xf32>
    %c0_81 = arith.constant 0 : index
    %c2_82 = arith.constant 2 : index
    %c0_83 = arith.constant 0 : index
    %c0_84 = arith.constant 0 : index
    %109 = vector.load %arg4[%c0_81, %c2_82, %c0_83, %c0_84] : memref<3x4x128x32xf32, #tpu.memory_space<vmem>>, vector<1x1x128x32xf32>
    %110 = vector.shape_cast %109 : vector<1x1x128x32xf32> to vector<128x32xf32>
    %cst_85 = arith.constant dense<0.000000e+00> : vector<8x32xf32>
    %111 = tpu.matmul %23, %110, %cst_85 {dimension_numbers = #tpu.dot_dimension_numbers<[1], [0], [0], [1], [0, 0, 1, 1], [], []>} : vector<8x128xf32>, vector<128x32xf32>, vector<8x32xf32> -> vector<8x32xf32>
    %c0_86 = arith.constant 0 : index
    %c2_87 = arith.constant 2 : index
    %c0_88 = arith.constant 0 : index
    %c0_89 = arith.constant 0 : index
    %112 = vector.load %arg5[%c0_86, %c2_87, %c0_88, %c0_89] : memref<3x4x1x32xf32, #tpu.memory_space<vmem>>, vector<1x1x1x32xf32>
    %113 = vector.shape_cast %112 : vector<1x1x1x32xf32> to vector<1x32xf32>
    %114 = vector.broadcast %113 : vector<1x32xf32> to vector<8x32xf32>
    %115 = arith.addf %111, %114 : vector<8x32xf32>
    %116 = vector.shape_cast %115 : vector<8x32xf32> to vector<1x8x32xf32>
    %c1_90 = arith.constant 1 : index
    %c2_91 = arith.constant 2 : index
    %c0_92 = arith.constant 0 : index
    %c0_93 = arith.constant 0 : index
    %117 = vector.load %arg4[%c1_90, %c2_91, %c0_92, %c0_93] : memref<3x4x128x32xf32, #tpu.memory_space<vmem>>, vector<1x1x128x32xf32>
    %118 = vector.shape_cast %117 : vector<1x1x128x32xf32> to vector<128x32xf32>
    %cst_94 = arith.constant dense<0.000000e+00> : vector<8x32xf32>
    %119 = tpu.matmul %23, %118, %cst_94 {dimension_numbers = #tpu.dot_dimension_numbers<[1], [0], [0], [1], [0, 0, 1, 1], [], []>} : vector<8x128xf32>, vector<128x32xf32>, vector<8x32xf32> -> vector<8x32xf32>
    %c1_95 = arith.constant 1 : index
    %c2_96 = arith.constant 2 : index
    %c0_97 = arith.constant 0 : index
    %c0_98 = arith.constant 0 : index
    %120 = vector.load %arg5[%c1_95, %c2_96, %c0_97, %c0_98] : memref<3x4x1x32xf32, #tpu.memory_space<vmem>>, vector<1x1x1x32xf32>
    %121 = vector.shape_cast %120 : vector<1x1x1x32xf32> to vector<1x32xf32>
    %122 = vector.broadcast %121 : vector<1x32xf32> to vector<8x32xf32>
    %123 = arith.addf %119, %122 : vector<8x32xf32>
    %124 = vector.shape_cast %123 : vector<8x32xf32> to vector<1x8x32xf32>
    %c2_99 = arith.constant 2 : index
    %c2_100 = arith.constant 2 : index
    %c0_101 = arith.constant 0 : index
    %c0_102 = arith.constant 0 : index
    %125 = vector.load %arg4[%c2_99, %c2_100, %c0_101, %c0_102] : memref<3x4x128x32xf32, #tpu.memory_space<vmem>>, vector<1x1x128x32xf32>
    %126 = vector.shape_cast %125 : vector<1x1x128x32xf32> to vector<128x32xf32>
    %cst_103 = arith.constant dense<0.000000e+00> : vector<8x32xf32>
    %127 = tpu.matmul %23, %126, %cst_103 {dimension_numbers = #tpu.dot_dimension_numbers<[1], [0], [0], [1], [0, 0, 1, 1], [], []>} : vector<8x128xf32>, vector<128x32xf32>, vector<8x32xf32> -> vector<8x32xf32>
    %c2_104 = arith.constant 2 : index
    %c2_105 = arith.constant 2 : index
    %c0_106 = arith.constant 0 : index
    %c0_107 = arith.constant 0 : index
    %128 = vector.load %arg5[%c2_104, %c2_105, %c0_106, %c0_107] : memref<3x4x1x32xf32, #tpu.memory_space<vmem>>, vector<1x1x1x32xf32>
    %129 = vector.shape_cast %128 : vector<1x1x1x32xf32> to vector<1x32xf32>
    %130 = vector.broadcast %129 : vector<1x32xf32> to vector<8x32xf32>
    %131 = arith.addf %127, %130 : vector<8x32xf32>
    %132 = vector.shape_cast %131 : vector<8x32xf32> to vector<1x8x32xf32>
    "tpu.trace_start"() <{level = 10 : i32, message = "bqd,bkd->bqk"}> : () -> ()
    %cst_108 = arith.constant dense<0.000000e+00> : vector<1x8x8xf32>
    %133 = tpu.matmul %116, %124, %cst_108 {dimension_numbers = #tpu.dot_dimension_numbers<[2], [2], [1], [1], [0, 0, 0, 1, 1, 1], [0], [0]>} : vector<1x8x32xf32>, vector<1x8x32xf32>, vector<1x8x8xf32> -> vector<1x8x8xf32>
    "tpu.trace_stop"() : () -> ()
    %cst_109 = arith.constant dense<0xFF800000> : vector<1x8xf32>
    %134 = vector.multi_reduction <maximumf>, %133, %cst_109 [2] : vector<1x8x8xf32> to vector<1x8xf32>
    %135 = vector.shape_cast %134 : vector<1x8xf32> to vector<1x8x1xf32>
    %136 = vector.broadcast %135 : vector<1x8x1xf32> to vector<1x8x8xf32>
    %137 = arith.subf %133, %136 : vector<1x8x8xf32>
    %138 = math.exp %137 : vector<1x8x8xf32>
    %cst_110 = arith.constant dense<0.000000e+00> : vector<1x8xf32>
    %139 = vector.multi_reduction <add>, %138, %cst_110 [2] : vector<1x8x8xf32> to vector<1x8xf32>
    %140 = vector.shape_cast %139 : vector<1x8xf32> to vector<1x8x1xf32>
    "tpu.trace_start"() <{level = 10 : i32, message = "bqk,bkd->bqd"}> : () -> ()
    %cst_111 = arith.constant dense<0.000000e+00> : vector<1x8x32xf32>
    %141 = tpu.matmul %138, %132, %cst_111 {dimension_numbers = #tpu.dot_dimension_numbers<[2], [1], [1], [2], [0, 0, 0, 1, 1, 2], [0], [0]>} : vector<1x8x8xf32>, vector<1x8x32xf32>, vector<1x8x32xf32> -> vector<1x8x32xf32>
    "tpu.trace_stop"() : () -> ()
    %cst_112 = arith.constant 1.000000e+00 : f32
    %142 = vector.broadcast %cst_112 : f32 to vector<1x8x1xf32>
    %143 = arith.divf %142, %140 : vector<1x8x1xf32>
    %144 = vector.broadcast %143 : vector<1x8x1xf32> to vector<1x8x32xf32>
    %145 = arith.mulf %141, %144 : vector<1x8x32xf32>
    %146 = vector.shape_cast %145 : vector<1x8x32xf32> to vector<8x32xf32>
    %c2_113 = arith.constant 2 : index
    %c0_114 = arith.constant 0 : index
    %c0_115 = arith.constant 0 : index
    %147 = vector.load %arg6[%c2_113, %c0_114, %c0_115] : memref<4x32x128xf32, #tpu.memory_space<vmem>>, vector<1x32x128xf32>
    %148 = vector.shape_cast %147 : vector<1x32x128xf32> to vector<32x128xf32>
    %cst_116 = arith.constant dense<0.000000e+00> : vector<8x128xf32>
    %149 = tpu.matmul %146, %148, %cst_116 {dimension_numbers = #tpu.dot_dimension_numbers<[1], [0], [0], [1], [0, 0, 1, 1], [], []>} : vector<8x32xf32>, vector<32x128xf32>, vector<8x128xf32> -> vector<8x128xf32>
    %150 = arith.addf %108, %149 : vector<8x128xf32>
    %c0_117 = arith.constant 0 : index
    %c3 = arith.constant 3 : index
    %c0_118 = arith.constant 0 : index
    %c0_119 = arith.constant 0 : index
    %151 = vector.load %arg4[%c0_117, %c3, %c0_118, %c0_119] : memref<3x4x128x32xf32, #tpu.memory_space<vmem>>, vector<1x1x128x32xf32>
    %152 = vector.shape_cast %151 : vector<1x1x128x32xf32> to vector<128x32xf32>
    %cst_120 = arith.constant dense<0.000000e+00> : vector<8x32xf32>
    %153 = tpu.matmul %23, %152, %cst_120 {dimension_numbers = #tpu.dot_dimension_numbers<[1], [0], [0], [1], [0, 0, 1, 1], [], []>} : vector<8x128xf32>, vector<128x32xf32>, vector<8x32xf32> -> vector<8x32xf32>
    %c0_121 = arith.constant 0 : index
    %c3_122 = arith.constant 3 : index
    %c0_123 = arith.constant 0 : index
    %c0_124 = arith.constant 0 : index
    %154 = vector.load %arg5[%c0_121, %c3_122, %c0_123, %c0_124] : memref<3x4x1x32xf32, #tpu.memory_space<vmem>>, vector<1x1x1x32xf32>
    %155 = vector.shape_cast %154 : vector<1x1x1x32xf32> to vector<1x32xf32>
    %156 = vector.broadcast %155 : vector<1x32xf32> to vector<8x32xf32>
    %157 = arith.addf %153, %156 : vector<8x32xf32>
    %158 = vector.shape_cast %157 : vector<8x32xf32> to vector<1x8x32xf32>
    %c1_125 = arith.constant 1 : index
    %c3_126 = arith.constant 3 : index
    %c0_127 = arith.constant 0 : index
    %c0_128 = arith.constant 0 : index
    %159 = vector.load %arg4[%c1_125, %c3_126, %c0_127, %c0_128] : memref<3x4x128x32xf32, #tpu.memory_space<vmem>>, vector<1x1x128x32xf32>
    %160 = vector.shape_cast %159 : vector<1x1x128x32xf32> to vector<128x32xf32>
    %cst_129 = arith.constant dense<0.000000e+00> : vector<8x32xf32>
    %161 = tpu.matmul %23, %160, %cst_129 {dimension_numbers = #tpu.dot_dimension_numbers<[1], [0], [0], [1], [0, 0, 1, 1], [], []>} : vector<8x128xf32>, vector<128x32xf32>, vector<8x32xf32> -> vector<8x32xf32>
    %c1_130 = arith.constant 1 : index
    %c3_131 = arith.constant 3 : index
    %c0_132 = arith.constant 0 : index
    %c0_133 = arith.constant 0 : index
    %162 = vector.load %arg5[%c1_130, %c3_131, %c0_132, %c0_133] : memref<3x4x1x32xf32, #tpu.memory_space<vmem>>, vector<1x1x1x32xf32>
    %163 = vector.shape_cast %162 : vector<1x1x1x32xf32> to vector<1x32xf32>
    %164 = vector.broadcast %163 : vector<1x32xf32> to vector<8x32xf32>
    %165 = arith.addf %161, %164 : vector<8x32xf32>
    %166 = vector.shape_cast %165 : vector<8x32xf32> to vector<1x8x32xf32>
    %c2_134 = arith.constant 2 : index
    %c3_135 = arith.constant 3 : index
    %c0_136 = arith.constant 0 : index
    %c0_137 = arith.constant 0 : index
    %167 = vector.load %arg4[%c2_134, %c3_135, %c0_136, %c0_137] : memref<3x4x128x32xf32, #tpu.memory_space<vmem>>, vector<1x1x128x32xf32>
    %168 = vector.shape_cast %167 : vector<1x1x128x32xf32> to vector<128x32xf32>
    %cst_138 = arith.constant dense<0.000000e+00> : vector<8x32xf32>
    %169 = tpu.matmul %23, %168, %cst_138 {dimension_numbers = #tpu.dot_dimension_numbers<[1], [0], [0], [1], [0, 0, 1, 1], [], []>} : vector<8x128xf32>, vector<128x32xf32>, vector<8x32xf32> -> vector<8x32xf32>
    %c2_139 = arith.constant 2 : index
    %c3_140 = arith.constant 3 : index
    %c0_141 = arith.constant 0 : index
    %c0_142 = arith.constant 0 : index
    %170 = vector.load %arg5[%c2_139, %c3_140, %c0_141, %c0_142] : memref<3x4x1x32xf32, #tpu.memory_space<vmem>>, vector<1x1x1x32xf32>
    %171 = vector.shape_cast %170 : vector<1x1x1x32xf32> to vector<1x32xf32>
    %172 = vector.broadcast %171 : vector<1x32xf32> to vector<8x32xf32>
    %173 = arith.addf %169, %172 : vector<8x32xf32>
    %174 = vector.shape_cast %173 : vector<8x32xf32> to vector<1x8x32xf32>
    "tpu.trace_start"() <{level = 10 : i32, message = "bqd,bkd->bqk"}> : () -> ()
    %cst_143 = arith.constant dense<0.000000e+00> : vector<1x8x8xf32>
    %175 = tpu.matmul %158, %166, %cst_143 {dimension_numbers = #tpu.dot_dimension_numbers<[2], [2], [1], [1], [0, 0, 0, 1, 1, 1], [0], [0]>} : vector<1x8x32xf32>, vector<1x8x32xf32>, vector<1x8x8xf32> -> vector<1x8x8xf32>
    "tpu.trace_stop"() : () -> ()
    %cst_144 = arith.constant dense<0xFF800000> : vector<1x8xf32>
    %176 = vector.multi_reduction <maximumf>, %175, %cst_144 [2] : vector<1x8x8xf32> to vector<1x8xf32>
    %177 = vector.shape_cast %176 : vector<1x8xf32> to vector<1x8x1xf32>
    %178 = vector.broadcast %177 : vector<1x8x1xf32> to vector<1x8x8xf32>
    %179 = arith.subf %175, %178 : vector<1x8x8xf32>
    %180 = math.exp %179 : vector<1x8x8xf32>
    %cst_145 = arith.constant dense<0.000000e+00> : vector<1x8xf32>
    %181 = vector.multi_reduction <add>, %180, %cst_145 [2] : vector<1x8x8xf32> to vector<1x8xf32>
    %182 = vector.shape_cast %181 : vector<1x8xf32> to vector<1x8x1xf32>
    "tpu.trace_start"() <{level = 10 : i32, message = "bqk,bkd->bqd"}> : () -> ()
    %cst_146 = arith.constant dense<0.000000e+00> : vector<1x8x32xf32>
    %183 = tpu.matmul %180, %174, %cst_146 {dimension_numbers = #tpu.dot_dimension_numbers<[2], [1], [1], [2], [0, 0, 0, 1, 1, 2], [0], [0]>} : vector<1x8x8xf32>, vector<1x8x32xf32>, vector<1x8x32xf32> -> vector<1x8x32xf32>
    "tpu.trace_stop"() : () -> ()
    %cst_147 = arith.constant 1.000000e+00 : f32
    %184 = vector.broadcast %cst_147 : f32 to vector<1x8x1xf32>
    %185 = arith.divf %184, %182 : vector<1x8x1xf32>
    %186 = vector.broadcast %185 : vector<1x8x1xf32> to vector<1x8x32xf32>
    %187 = arith.mulf %183, %186 : vector<1x8x32xf32>
    %188 = vector.shape_cast %187 : vector<1x8x32xf32> to vector<8x32xf32>
    %c3_148 = arith.constant 3 : index
    %c0_149 = arith.constant 0 : index
    %c0_150 = arith.constant 0 : index
    %189 = vector.load %arg6[%c3_148, %c0_149, %c0_150] : memref<4x32x128xf32, #tpu.memory_space<vmem>>, vector<1x32x128xf32>
    %190 = vector.shape_cast %189 : vector<1x32x128xf32> to vector<32x128xf32>
    %cst_151 = arith.constant dense<0.000000e+00> : vector<8x128xf32>
    %191 = tpu.matmul %188, %190, %cst_151 {dimension_numbers = #tpu.dot_dimension_numbers<[1], [0], [0], [1], [0, 0, 1, 1], [], []>} : vector<8x32xf32>, vector<32x128xf32>, vector<8x128xf32> -> vector<8x128xf32>
    %192 = arith.addf %150, %191 : vector<8x128xf32>
    %c0_152 = arith.constant 0 : index
    %c0_153 = arith.constant 0 : index
    %193 = vector.load %arg7[%c0_152, %c0_153] : memref<1x128xf32, #tpu.memory_space<vmem>>, vector<1x128xf32>
    %194 = vector.broadcast %193 : vector<1x128xf32> to vector<8x128xf32>
    %195 = arith.addf %192, %194 : vector<8x128xf32>
    %196 = vector.shape_cast %195 : vector<8x128xf32> to vector<1x8x128xf32>
    %c0_154 = arith.constant 0 : index
    %c0_155 = arith.constant 0 : index
    %c0_156 = arith.constant 0 : index
    %197 = vector.load %arg8[%c0_154, %c0_155, %c0_156] : memref<1x8x128xf32, #tpu.memory_space<vmem>>, vector<1x8x128xf32>
    tpu.vector_store %arg8[%c0_154, %c0_155, %c0_156], %196 {strides = array<i32>} : memref<1x8x128xf32, #tpu.memory_space<vmem>>, vector<1x8x128xf32>,
    return
  }
  func.func @transform_0(%arg0: i32) -> (i32, i32, i32) {
    %c0_i32 = arith.constant 0 : i32
    %c0_i32_0 = arith.constant 0 : i32
    %c0_i32_1 = arith.constant 0 : i32
    return %arg0, %c0_i32, %c0_i32_0 : i32, i32, i32
  }
  func.func @transform_1(%arg0: i32) -> (i32, i32) {
    %c0_i32 = arith.constant 0 : i32
    %c0_i32_0 = arith.constant 0 : i32
    %c0_i32_1 = arith.constant 0 : i32
    return %c0_i32, %c0_i32_0 : i32, i32
  }
  func.func @transform_2(%arg0: i32) -> (i32, i32) {
    %c0_i32 = arith.constant 0 : i32
    %c0_i32_0 = arith.constant 0 : i32
    %c0_i32_1 = arith.constant 0 : i32
    return %c0_i32, %c0_i32_0 : i32, i32
  }
  func.func @transform_3(%arg0: i32) -> (i32, i32, i32, i32) {
    %c0_i32 = arith.constant 0 : i32
    %c0_i32_0 = arith.constant 0 : i32
    %c0_i32_1 = arith.constant 0 : i32
    %c0_i32_2 = arith.constant 0 : i32
    %c0_i32_3 = arith.constant 0 : i32
    return %c0_i32, %c0_i32_0, %c0_i32_1, %c0_i32_2 : i32, i32, i32, i32
  }
  func.func @transform_4(%arg0: i32) -> (i32, i32, i32, i32) {
    %c0_i32 = arith.constant 0 : i32
    %c0_i32_0 = arith.constant 0 : i32
    %c0_i32_1 = arith.constant 0 : i32
    %c0_i32_2 = arith.constant 0 : i32
    %c0_i32_3 = arith.constant 0 : i32
    return %c0_i32, %c0_i32_0, %c0_i32_1, %c0_i32_2 : i32, i32, i32, i32
  }
  func.func @transform_5(%arg0: i32) -> (i32, i32, i32) {
    %c0_i32 = arith.constant 0 : i32
    %c0_i32_0 = arith.constant 0 : i32
    %c0_i32_1 = arith.constant 0 : i32
    %c0_i32_2 = arith.constant 0 : i32
    return %c0_i32, %c0_i32_0, %c0_i32_1 : i32, i32, i32
  }
  func.func @transform_6(%arg0: i32) -> (i32, i32) {
    %c0_i32 = arith.constant 0 : i32
    %c0_i32_0 = arith.constant 0 : i32
    %c0_i32_1 = arith.constant 0 : i32
    return %c0_i32, %c0_i32_0 : i32, i32
  }
  func.func @transform_7(%arg0: i32) -> (i32, i32, i32) {
    %c0_i32 = arith.constant 0 : i32
    %c0_i32_0 = arith.constant 0 : i32
    %c0_i32_1 = arith.constant 0 : i32
    return %arg0, %c0_i32, %c0_i32_0 : i32, i32, i32
  }
}

</mosaic_0001>

<bundles_post_ra>
// kernel: tpu_custom_call.1
= control target key start
LH: loop header
LB: loop body
LE: loop exit
PB: predicated region body
PF: predicated region fallthrough
CT: control target
= control target key end

     0   :  { %12 = vsyncpa [#allocation3], 0  ;;  %s4699_s0 = inlined_call_operand.vmem [shape: f32[2,8,128], index: 0, kind: input, shape index: {}]   ;;  %s4700_s1 = inlined_call_operand.vmem [shape: f32[1,128], index: 1, kind: input, shape index: {}]   ;;  %s4701_s2 = inlined_call_operand.vmem [shape: f32[1,128], index: 2, kind: input, shape index: {}]   ;;  %s4702_s3 = inlined_call_operand.vmem [shape: f32[3,4,128,32], index: 3, kind: input, shape index: {}]   ;;  %s4703_s4 = inlined_call_operand.vmem [shape: f32[3,4,1,32], index: 4, kind: input, shape index: {}]   ;;  %s4704_s5 = inlined_call_operand.vmem [shape: f32[4,32,128], index: 5, kind: input, shape index: {}]   ;;  %s4705_s6 = inlined_call_operand.vmem [shape: f32[1,128], index: 6, kind: input, shape index: {}]   ;;  %s4706_s7 = inlined_call_operand.hbm [shape: f32[2,8,128], index: 7, kind: output, shape index: {}]  }
   0x1   :  { %14 = vsyncpa [#allocation3 + $0x1], 0  ;;  %s3630_s24 = smov 0   ;;  %s3632_s25 = smov 0  }
   0x2   :  { %s3634_s26 = smov 0   ;;  %s3636_s27 = smov 0  }
   0x3 LB: > { %s3651_s28 = sadd.s32 4294967295, %s3585_s27   ;;  %s2482_s29 = sadd.s32 4294967294, %s3585_s27   ;;  %s3585_s27 = sphi %s3636_s27, %s4712_s27   ;;  %s3581_s26 = sphi %s3634_s26, %s4711_s26   ;;  %s3577_s25 = sphi %s3632_s25, %s4710_s25   ;;  %s3573_s24 = sphi %s3630_s24, %s4709_s24  }
   0x4   : > { %s3655_s30 = sadd.s32 1, %s3585_s27   ;;  %s179_s8 = sadd.s32 1, %s3581_s26 }
   0x5   : > { %s176_s9 = ssub.s32 %s3585_s27, %s3655_s30  ;;  %p189_p0 = scmp.ne.s32.totalorder %s3581_s26, %s3577_s25 }
   0x6   : > { %p177_p1 = scmp.eq.s32.totalorder %s176_s9, 0  ;;  %p190_p2 = scmp.eq.s32.totalorder %s3651_s28, 1 }
   0x7   : > { %p195_p3 = scmp.ne.s32.totalorder %s3577_s25, %s3573_s24  ;;  %p196_p4 = scmp.eq.s32.totalorder %s2482_s29, 1 }
   0x8   : > { %s3666_s10 = scalar_select %p177_p1, %s3581_s26, %s179_s8  }
   0x9   : > { %p3668_p5 = por %p190_p2, %p189_p0  ;;  %p3672_p6 = por %p196_p4, %p195_p3 }
   0xa   : > { %p2485_p7 = scmp.ge.s32.totalorder %s3585_s27, 1  ;;  %p239_p8 = scmp.lt.s32.totalorder %s3585_s27, 3 }
   0xc   : > { %p240_p9 = pnand %p2485_p7, %p239_p8 }
   0xd   : > { %p270_p10 = scmp.lt.s32.totalorder (!%p240_p9), %s3651_s28, 1  ;;  %s2719_s18 = sshll.u32 (!%p240_p9), %s3651_s28, 7 }
   0xe   : > { %243 = sbr.rel (%p240_p9) target bundleno = 3404 (0xd4c), region = 48  ;;  %s2421_s23 = scalar_lea.hbm (!%p240_p9), %s4706_s7, %s2719_s18 }
   0xf   : > { %s3589_s9 = smov (!%p240_p9), [#allocation2]  }
  0x13   : > { %s271_s13 = scalar_select %p270_p10, %s3651_s28, 1  ;;  %v318_v1 = vld [vmem:[%s4702_s3 + $0x78] sm:$0xff]  ;;  %v3587_v3 = vmov 0.0   ;;  %v317_v4 = vld [vmem:[%s4702_s3 + $0x70] sm:$0xff]  ;;  %v316_v6 = vld [vmem:[%s4702_s3 + $0x68] sm:$0xff]  ;;  %vm3588_vm0 = vmmov 0  }
  0x14   : > { %v2506_v2 = vld [vmem:[%s4702_s3 + $0x278] sm:$0xff]  ;;  %2962 = vmatprep.subr.mxu0 %v3587_v3  ;;  %2997 = vmatprep.subr.mxu1 %v3587_v3  ;;  %v2505_v5 = vld [vmem:[%s4702_s3 + $0x270] sm:$0xff]  ;;  %v2504_v7 = vld [vmem:[%s4702_s3 + $0x268] sm:$0xff]  ;;  %vm586_vm1 = vcmask 261120   ;;  %vm663_vm2 = vcmask 64512  }
  0x15   : > { %s2487_s14 = sshll.u32 %s271_s13, 3  ;;  %2963 = vmatpush3.msra.mxu0 %v318_v1  ;;  %2998 = vmatpush3.msra.mxu1 %v2506_v2  ;;  %v315_v8 = vld [vmem:[%s4702_s3 + $0x60] sm:$0xff]  ;;  %v314_v14 = vld [vmem:[%s4702_s3 + $0x58] sm:$0xff]  ;;  %v313_v16 = vld [vmem:[%s4702_s3 + $0x50] sm:$0xff]  ;;  %s3529_s13 = sshll.u32 %s3589_s9, 4  ;;  %s3530_s13 = int_to_ptr.vmem [resolvable:$false] %s3529_s13 }
  0x16   : > { %s273_s17 = scalar_lea.vmem %s4699_s0, %s2487_s14  ;;  %2964 = vmatprep.subr.mxu0 %v3587_v3  ;;  %2999 = vmatprep.subr.mxu1 %v3587_v3  ;;  %v2503_v9 = vld [vmem:[%s4702_s3 + $0x260] sm:$0xff]  ;;  %v2502_v15 = vld [vmem:[%s4702_s3 + $0x258] sm:$0xff]  ;;  %v2501_v17 = vld [vmem:[%s4702_s3 + $0x250] sm:$0xff]  ;;  %s267_s14 = sand.u32 1, %s3577_s25  }
  0x17   : > { %v274_v0 = vld [vmem:[%s273_s17] sm:$0xff]  ;;  %2965 = vmatpush3.msra.mxu0 %v317_v4  ;;  %3000 = vmatpush3.msra.mxu1 %v2505_v5  ;;  %v312_v18 = vld [vmem:[%s4702_s3 + $0x48] sm:$0xff]  ;;  %v310_v22 = vld [vmem:[%s4702_s3 + $0x38] sm:$0xff]  ;;  %s2486_s15 = sshll.u32 %s267_s14, 3  ;;  %s2410_s29 = scalar_lea.sflag [#allocation3], %s267_s14 }
  0x18   : > { %275 = vadd.xlane.f32.xlu0 %v274_v0  ;;  %2966 = vmatprep.subr.mxu0 %v3587_v3  ;;  %v2500_v19 = vld [vmem:[%s4702_s3 + $0x248] sm:$0xff]  ;;  %v311_v20 = vld [vmem:[%s4702_s3 + $0x40] sm:$0xff]  ;;  %v2498_v23 = vld [vmem:[%s4702_s3 + $0x238] sm:$0xff]  ;;  %s269_s19 = scalar_lea.vmem [#allocation2], %s2486_s15  ;;  %s3531_s28 = scalar_lea.vmem %s3530_s13, 256 }
  0x19   : > { %3001 = vmatprep.subr.mxu1 %v3587_v3  ;;  %2967 = vmatpush3.msra.mxu0 %v316_v6  ;;  %v2499_v21 = vld [vmem:[%s4702_s3 + $0x240] sm:$0xff]  ;;  %v309_v24 = vld [vmem:[%s4702_s3 + $0x30] sm:$0xff]  ;;  %v308_v26 = vld [vmem:[%s4702_s3 + $0x28] sm:$0xff]  ;;  %s2423_s20 = sshll.u32 %s269_s19, 4  ;;  %s2424_s20 = int_to_ptr.vmem [resolvable:$true] %s2423_s20 }
  0x1a   : > { %3002 = vmatpush3.msra.mxu1 %v2504_v7  ;;  %2968 = vmatprep.subr.mxu0 %v3587_v3  ;;  %v2497_v25 = vld [vmem:[%s4702_s3 + $0x230] sm:$0xff]  ;;  %v2496_v27 = vld [vmem:[%s4702_s3 + $0x228] sm:$0xff]  ;;  %v307_v28 = vld [vmem:[%s4702_s3 + $0x20] sm:$0xff]  ;;  %s3525_s8 = scalar_lea.vmem %s2424_s20, 128  ;;  %p3532_p0 = scmp.lt.s32.totalorder %s2424_s20, %s3530_s13 }
  0x1b   : > { %3003 = vmatprep.subr.mxu1 %v3587_v3  ;;  %2969 = vmatpush3.msra.mxu0 %v315_v8  ;;  %v2495_v29 = vld [vmem:[%s4702_s3 + $0x220] sm:$0xff]  ;;  %v306_v30 = vld [vmem:[%s4702_s3 + $0x18] sm:$0xff]  ;;  %v305_v32 = vld [vmem:[%s4702_s3 + $0x10] sm:$0xff]  ;;  %p3526_p11 = scmp.ne.s32.totalorder %s2424_s20, %s3525_s8  ;;  %p3533_p1 = scmp.lt.s32.totalorder %s3531_s28, %s3525_s8 }
  0x1c   : > { %3004 = vmatpush3.msra.mxu1 %v2503_v9  ;;  %2970 = vmatprep.subr.mxu0 %v3587_v3  ;;  %v2494_v31 = vld [vmem:[%s4702_s3 + $0x218] sm:$0xff]  ;;  %v2493_v33 = vld [vmem:[%s4702_s3 + $0x210] sm:$0xff]  ;;  %v304_v34 = vld [vmem:[%s4702_s3 + $0x8] sm:$0xff] }
  0x1d   : > { %3005 = vmatprep.subr.mxu1 %v3587_v3  ;;  %2971 = vmatpush3.msra.mxu0 %v314_v14  ;;  %v2492_v35 = vld [vmem:[%s4702_s3 + $0x208] sm:$0xff]  ;;  %v303_v36 = vld [vmem:[%s4702_s3] sm:$0xff]  ;;  %v2524_v47 = vld [vmem:[%s4702_s3 + $0x478] sm:$0xff]  ;;  %p3527_p12 = pnand %p3526_p11, %p3668_p5  ;;  %p3534_p2 = por %p3533_p1, %p3532_p0 }
  0x1e   : > { %2972 = vmatprep.subr.mxu0 %v3587_v3  ;;  %3006 = vmatpush3.msra.mxu1 %v2502_v15  ;;  %v2491_v37 = vld [vmem:[%s4702_s3 + $0x200] sm:$0xff]  ;;  %v2523_v48 = vld [vmem:[%s4702_s3 + $0x470] sm:$0xff]  ;;  %v2522_v49 = vld [vmem:[%s4702_s3 + $0x468] sm:$0xff] }
  0x1f   : > { %2973 = vmatpush3.msra.mxu0 %v313_v16  ;;  %3007 = vmatprep.subr.mxu1 %v3587_v3  ;;  %v2488_v42 = vld [vmem:[%s4700_s1] ss:$0 sm:$0xff]  ;;  %v2520_v51 = vld [vmem:[%s4702_s3 + $0x458] sm:$0xff]  ;;  %v2519_v52 = vld [vmem:[%s4702_s3 + $0x450] sm:$0xff]  ;;  %p3528_p13 = pneg %p3527_p12 }
  0x20   : > { %2974 = vmatprep.subr.mxu0 %v3587_v3  ;;  %3008 = vmatpush3.msra.mxu1 %v2501_v17  ;;  %v2489_v44 = vld [vmem:[%s4701_s2] ss:$0 sm:$0xff]  ;;  %v2518_v53 = vld [vmem:[%s4702_s3 + $0x448] sm:$0xff]  ;;  %v2516_v55 = vld [vmem:[%s4702_s3 + $0x438] sm:$0xff] }
  0x21   : > { %2975 = vmatpush3.msra.mxu0 %v312_v18  ;;  %3009 = vmatprep.subr.mxu1 %v3587_v3  ;;  %v2521_v50 = vld [vmem:[%s4702_s3 + $0x460] sm:$0xff]  ;;  %v2515_v56 = vld [vmem:[%s4702_s3 + $0x430] sm:$0xff]  ;;  %v2514_v57 = vld [vmem:[%s4702_s3 + $0x428] sm:$0xff]  ;;  %p3535_p3 = pnand %p3534_p2, %p3528_p13 }
  0x22   : > { %2976 = vmatprep.subr.mxu0 %v3587_v3  ;;  %3010 = vmatpush3.msra.mxu1 %v2500_v19  ;;  %v2517_v54 = vld [vmem:[%s4702_s3 + $0x440] sm:$0xff]  ;;  %v2512_v59 = vld [vmem:[%s4702_s3 + $0x418] sm:$0xff]  ;;  %v2511_v60 = vld [vmem:[%s4702_s3 + $0x410] sm:$0xff] }
  0x23   : > { %2977 = vmatpush3.msra.mxu0 %v311_v20  ;;  %3011 = vmatprep.subr.mxu1 %v3587_v3  ;;  %v2513_v58 = vld [vmem:[%s4702_s3 + $0x420] sm:$0xff]  ;;  %v2510_v61 = vld [vmem:[%s4702_s3 + $0x408] sm:$0xff]  ;;  %v2563_v63 = vld [vmem:[%s4702_s3 + $0x2f8] sm:$0xff] }
  0x24   : > { %2978 = vmatprep.subr.mxu0 %v3587_v3  ;;  %3012 = vmatpush3.msra.mxu1 %v2499_v21  ;;  %v2509_v62 = vld [vmem:[%s4702_s3 + $0x400] sm:$0xff]  ;;  %v2561_v1 = vld [vmem:[%s4702_s3 + $0x2e8] sm:$0xff]  ;;  %v2559_v4 = vld [vmem:[%s4702_s3 + $0x2d8] sm:$0xff] }
  0x25   : > { %2979 = vmatpush3.msra.mxu0 %v310_v22  ;;  %3013 = vmatprep.subr.mxu1 %v3587_v3  ;;  %v2560_v2 = vld [vmem:[%s4702_s3 + $0x2e0] sm:$0xff]  ;;  %v2558_v5 = vld [vmem:[%s4702_s3 + $0x2d0] sm:$0xff]  ;;  %v2557_v6 = vld [vmem:[%s4702_s3 + $0x2c8] sm:$0xff] }
  0x26   : > { %2980 = vmatprep.subr.mxu0 %v3587_v3  ;;  %3014 = vmatpush3.msra.mxu1 %v2498_v23  ;;  %v2556_v7 = vld [vmem:[%s4702_s3 + $0x2c0] sm:$0xff]  ;;  %v2555_v8 = vld [vmem:[%s4702_s3 + $0x2b8] sm:$0xff]  ;;  %v2554_v9 = vld [vmem:[%s4702_s3 + $0x2b0] sm:$0xff] }
  0x27   : > { %2981 = vmatpush3.msra.mxu0 %v309_v24  ;;  %3015 = vmatprep.subr.mxu1 %v3587_v3  ;;  %v2549_v14 = vld [vmem:[%s4702_s3 + $0x288] sm:$0xff]  ;;  %v2548_v15 = vld [vmem:[%s4702_s3 + $0x280] sm:$0xff] }
  0x28   : > { %2982 = vmatprep.subr.mxu0 %v3587_v3  ;;  %3016 = vmatpush3.msra.mxu1 %v2497_v25  ;;  %v2508_v16 = vld [vmem:[%s4703_s4 + $0x4] ss:$0 sm:$0xff]  ;;  %v2490_v19 = vld [vmem:[%s4703_s4] ss:$0 sm:$0xff]  ;;  %v2526_v24 = vld [vmem:[%s4703_s4 + $0x8] ss:$0 sm:$0xff] }
  0x29   : > { %2983 = vmatpush3.msra.mxu0 %v308_v26  ;;  %3017 = vmatprep.subr.mxu1 %v3587_v3 }
  0x2a   : > { %2984 = vmatprep.subr.mxu0 %v3587_v3  ;;  %3018 = vmatpush3.msra.mxu1 %v2496_v27 }
  0x2b   : > { %2985 = vmatpush3.msra.mxu0 %v307_v28  ;;  %3019 = vmatprep.subr.mxu1 %v3587_v3  ;;  %v2565_v28 = vld [vmem:[%s4703_s4 + $0x5] ss:$0 sm:$0xff] }
  0x2c   : > { %2986 = vmatprep.subr.mxu0 %v3587_v3  ;;  %3020 = vmatpush3.msra.mxu1 %v2495_v29 }
  0x2d   : > { %2987 = vmatpush3.msra.mxu0 %v306_v30  ;;  %3021 = vmatprep.subr.mxu1 %v3587_v3 }
  0x2e   : > { %2988 = vmatprep.subr.mxu0 %v3587_v3  ;;  %3022 = vmatpush3.msra.mxu1 %v2494_v31 }
  0x2f   : > { %2989 = vmatpush3.msra.mxu0 %v305_v32  ;;  %3023 = vmatprep.subr.mxu1 %v3587_v3 }
  0x30   : > { %2990 = vmatprep.subr.mxu0 %v3587_v3  ;;  %3024 = vmatpush3.msra.mxu1 %v2493_v33 }
  0x31   : > { %2991 = vmatpush3.msra.mxu0 %v304_v34  ;;  %3025 = vmatprep.subr.mxu1 %v3587_v3 }
  0x32   : > { %2992 = vmatprep.subr.mxu0 %v3587_v3  ;;  %3026 = vmatpush3.msra.mxu1 %v2492_v35 }
  0x33   : > { %2993 = vmatpush3.msra.mxu0 %v303_v36  ;;  %3027 = vmatprep.subr.mxu1 %v3587_v3 }
  0x34   : > { %2994 = vmatprep.mubr.msk.f32.mxu0 %vm3588_vm0, %v3587_v3  ;;  %3028 = vmatpush3.msra.mxu1 %v2491_v37 }
  0x35   : > { %3029 = vmatprep.mubr.msk.f32.mxu1 %vm3588_vm0, %v3587_v3  ;;  %3032 = vmatprep.subr.mxu0 %v3587_v3 }
  0x36   : > { %3067 = vmatprep.subr.mxu1 %v3587_v3 }
  0xa1   : > { %v276_v10 = vpop.xlane.xlu0 %275 }
  0xa2   : > { %v278_v11 = vmul.f32 0.0078125, %v276_v10  ;;  %v2553_v10 = vld [vmem:[%s4702_s3 + $0x2a8] sm:$0xff] }
  0xa4   : > { %v3717_v12 = vsub.f32 %v274_v0, %v278_v11  ;;  %v2562_v0 = vld [vmem:[%s4702_s3 + $0x2f0] sm:$0xff]  ;;  %v2552_v11 = vld [vmem:[%s4702_s3 + $0x2a0] sm:$0xff] }
  0xa6   : > { %v280_v13 = vmul.f32 %v3717_v12, %v3717_v12 }
  0xa8   : > { %281 = vadd.xlane.f32.xlu0 %v280_v13  ;;  %v2550_v13 = vld [vmem:[%s4702_s3 + $0x290] sm:$0xff] }
 0x131   : > { %v282_v38 = vpop.xlane.xlu0 %281 }
 0x132   : > { %v283_v39 = vmul.f32 0.0078125, %v282_v38  ;;  %v2545_v38 = vld [vmem:[%s4702_s3 + $0xf8] sm:$0xff] }
 0x134   : > { %v284_v40 = vadd.f32 1e-05, %v283_v39 }
 0x136   : > { %3507 = vrsqrt.f32 %v284_v40 }
 0x143   : > { %v3508_v41 = vpop.eup %3507 }
 0x144   : > { %v286_v43 = vmul.f32 %v3508_v41, %v3717_v12  ;;  %v2551_v12 = vld [vmem:[%s4702_s3 + $0x298] sm:$0xff]  ;;  %v2544_v41 = vld [vmem:[%s4702_s3 + $0xf0] sm:$0xff] }
 0x146   : > { %v294_v45 = vmul.f32 %v2488_v42, %v286_v43  ;;  %v2543_v42 = vld [vmem:[%s4702_s3 + $0xe8] sm:$0xff]  ;;  %v2542_v43 = vld [vmem:[%s4702_s3 + $0xe0] sm:$0xff] }
 0x148   : > { %v3828_v46 = vadd.f32 %v2489_v44, %v294_v45  ;;  %v2541_v44 = vld [vmem:[%s4702_s3 + $0xd8] sm:$0xff]  ;;  %v2540_v45 = vld [vmem:[%s4702_s3 + $0xd0] sm:$0xff] }
 0x14a   : > { %2995 = vmatmul.mubr.f32.vlgmr.msra.gmra.mxu0 %v3828_v46  ;;  %3030 = vmatmul.mubr.f32.vlgmr.msra.gmra.mxu1 %v3828_v46 }
 0x14b   : > { %3033 = vmatpush3.msra.mxu0 %v2524_v47  ;;  %3064 = vmatprep.mubr.msk.f32.mxu0 %vm3588_vm0, %v3587_v3  ;;  %v2539_v47 = vld [vmem:[%s4702_s3 + $0xc8] sm:$0xff] }
 0x14c   : > { %3034 = vmatprep.subr.mxu0 %v3587_v3  ;;  %3069 = vmatprep.mubr.msk.f32.mxu1 %vm3588_vm0, %v3587_v3 }
 0x14d   : > { %3035 = vmatpush3.msra.mxu0 %v2523_v48  ;;  %v2538_v48 = vld [vmem:[%s4702_s3 + $0xc0] sm:$0xff] }
 0x14e   : > { %3036 = vmatprep.subr.mxu0 %v3587_v3 }
 0x14f   : > { %3037 = vmatpush3.msra.mxu0 %v2522_v49  ;;  %v2537_v49 = vld [vmem:[%s4702_s3 + $0xb8] sm:$0xff] }
 0x150   : > { %3038 = vmatprep.subr.mxu0 %v3587_v3 }
 0x151   : > { %3039 = vmatpush3.msra.mxu0 %v2521_v50  ;;  %v2536_v50 = vld [vmem:[%s4702_s3 + $0xb0] sm:$0xff] }
 0x152   : > { %3040 = vmatprep.subr.mxu0 %v3587_v3 }
 0x153   : > { %3041 = vmatpush3.msra.mxu0 %v2520_v51  ;;  %v2535_v51 = vld [vmem:[%s4702_s3 + $0xa8] sm:$0xff] }
 0x154   : > { %3042 = vmatprep.subr.mxu0 %v3587_v3 }
 0x155   : > { %3043 = vmatpush3.msra.mxu0 %v2519_v52  ;;  %v2534_v52 = vld [vmem:[%s4702_s3 + $0xa0] sm:$0xff] }
 0x156   : > { %3044 = vmatprep.subr.mxu0 %v3587_v3 }
 0x157   : > { %3045 = vmatpush3.msra.mxu0 %v2518_v53  ;;  %v2533_v53 = vld [vmem:[%s4702_s3 + $0x98] sm:$0xff] }
 0x158   : > { %3046 = vmatprep.subr.mxu0 %v3587_v3 }
 0x159   : > { %3047 = vmatpush3.msra.mxu0 %v2517_v54  ;;  %v2532_v54 = vld [vmem:[%s4702_s3 + $0x90] sm:$0xff] }
 0x15a   : > { %3048 = vmatprep.subr.mxu0 %v3587_v3 }
 0x15b   : > { %3049 = vmatpush3.msra.mxu0 %v2516_v55  ;;  %v2531_v55 = vld [vmem:[%s4702_s3 + $0x88] sm:$0xff] }
 0x15c   : > { %3050 = vmatprep.subr.mxu0 %v3587_v3 }
 0x15d   : > { %3051 = vmatpush3.msra.mxu0 %v2515_v56  ;;  %v2530_v56 = vld [vmem:[%s4702_s3 + $0x80] sm:$0xff] }
 0x15e   : > { %3052 = vmatprep.subr.mxu0 %v3587_v3 }
 0x15f   : > { %3053 = vmatpush3.msra.mxu0 %v2514_v57  ;;  %v2581_v57 = vld [vmem:[%s4702_s3 + $0x4f8] sm:$0xff] }
 0x160   : > { %3054 = vmatprep.subr.mxu0 %v3587_v3 }
 0x161   : > { %3055 = vmatpush3.msra.mxu0 %v2513_v58  ;;  %v2580_v58 = vld [vmem:[%s4702_s3 + $0x4f0] sm:$0xff] }
 0x162   : > { %3056 = vmatprep.subr.mxu0 %v3587_v3 }
 0x163   : > { %3057 = vmatpush3.msra.mxu0 %v2512_v59  ;;  %v2579_v59 = vld [vmem:[%s4702_s3 + $0x4e8] sm:$0xff] }
 0x164   : > { %3058 = vmatprep.subr.mxu0 %v3587_v3 }
 0x165   : > { %3059 = vmatpush3.msra.mxu0 %v2511_v60  ;;  %v2578_v60 = vld [vmem:[%s4702_s3 + $0x4e0] sm:$0xff] }
 0x166   : > { %3060 = vmatprep.subr.mxu0 %v3587_v3 }
 0x167   : > { %3061 = vmatpush3.msra.mxu0 %v2510_v61  ;;  %v2577_v61 = vld [vmem:[%s4702_s3 + $0x4d8] sm:$0xff] }
 0x168   : > { %3062 = vmatprep.subr.mxu0 %v3587_v3 }
 0x169   : > { %3063 = vmatpush3.msra.mxu0 %v2509_v62  ;;  %v2576_v62 = vld [vmem:[%s4702_s3 + $0x4d0] sm:$0xff] }
 0x16a   : > { %3065 = vmatmul.mubr.f32.vlgmr.msra.gmra.mxu0 %v3828_v46  ;;  %3112 = vmatprep.subr.mxu0 %v3587_v3 }
 0x16b   : > { %3113 = vmatpush3.msra.mxu0 %v2563_v63  ;;  %3144 = vmatprep.mubr.msk.f32.mxu0 %vm3588_vm0, %v3587_v3  ;;  %v2575_v63 = vld [vmem:[%s4702_s3 + $0x4c8] sm:$0xff] }
 0x16c   : > { %3114 = vmatprep.subr.mxu0 %v3587_v3 }
 0x16d   : > { %3115 = vmatpush3.msra.mxu0 %v2562_v0  ;;  %v2574_v0 = vld [vmem:[%s4702_s3 + $0x4c0] sm:$0xff] }
 0x16e   : > { %3116 = vmatprep.subr.mxu0 %v3587_v3 }
 0x16f   : > { %3117 = vmatpush3.msra.mxu0 %v2561_v1  ;;  %v2573_v1 = vld [vmem:[%s4702_s3 + $0x4b8] sm:$0xff] }
 0x170   : > { %3118 = vmatprep.subr.mxu0 %v3587_v3 }
 0x171   : > { %3119 = vmatpush3.msra.mxu0 %v2560_v2  ;;  %v2572_v2 = vld [vmem:[%s4702_s3 + $0x4b0] sm:$0xff] }
 0x172   : > { %3120 = vmatprep.subr.mxu0 %v3587_v3 }
 0x173   : > { %3121 = vmatpush3.msra.mxu0 %v2559_v4  ;;  %v2571_v4 = vld [vmem:[%s4702_s3 + $0x4a8] sm:$0xff] }
 0x174   : > { %3122 = vmatprep.subr.mxu0 %v3587_v3 }
 0x175   : > { %3123 = vmatpush3.msra.mxu0 %v2558_v5  ;;  %v2570_v5 = vld [vmem:[%s4702_s3 + $0x4a0] sm:$0xff] }
 0x176   : > { %3124 = vmatprep.subr.mxu0 %v3587_v3 }
 0x177   : > { %3125 = vmatpush3.msra.mxu0 %v2557_v6  ;;  %v2569_v6 = vld [vmem:[%s4702_s3 + $0x498] sm:$0xff] }
 0x178   : > { %3126 = vmatprep.subr.mxu0 %v3587_v3 }
 0x179   : > { %3127 = vmatpush3.msra.mxu0 %v2556_v7  ;;  %v2568_v7 = vld [vmem:[%s4702_s3 + $0x490] sm:$0xff] }
 0x17a   : > { %3128 = vmatprep.subr.mxu0 %v3587_v3 }
 0x17b   : > { %3129 = vmatpush3.msra.mxu0 %v2555_v8  ;;  %v2567_v8 = vld [vmem:[%s4702_s3 + $0x488] sm:$0xff] }
 0x17c   : > { %3130 = vmatprep.subr.mxu0 %v3587_v3 }
 0x17d   : > { %3131 = vmatpush3.msra.mxu0 %v2554_v9  ;;  %v2566_v9 = vld [vmem:[%s4702_s3 + $0x480] sm:$0xff] }
 0x17e   : > { %3132 = vmatprep.subr.mxu0 %v3587_v3 }
 0x17f   : > { %3133 = vmatpush3.msra.mxu0 %v2553_v10  ;;  %v752_v10 = vld [vmem:[%s4704_s5 + $0x18] sm:$0xff] }
 0x180   : > { %3134 = vmatprep.subr.mxu0 %v3587_v3 }
 0x181   : > { %3135 = vmatpush3.msra.mxu0 %v2552_v11  ;;  %v751_v11 = vld [vmem:[%s4704_s5 + $0x10] sm:$0xff] }
 0x182   : > { %3136 = vmatprep.subr.mxu0 %v3587_v3 }
 0x183   : > { %3137 = vmatpush3.msra.mxu0 %v2551_v12  ;;  %v750_v12 = vld [vmem:[%s4704_s5 + $0x8] sm:$0xff] }
 0x184   : > { %3138 = vmatprep.subr.mxu0 %v3587_v3 }
 0x185   : > { %3139 = vmatpush3.msra.mxu0 %v2550_v13  ;;  %v749_v13 = vld [vmem:[%s4704_s5] sm:$0xff] }
 0x186   : > { %3140 = vmatprep.subr.mxu0 %v3587_v3 }
 0x187   : > { %3141 = vmatpush3.msra.mxu0 %v2549_v14 }
 0x188   : > { %3142 = vmatprep.subr.mxu0 %v3587_v3 }
 0x189   : > { %3143 = vmatpush3.msra.mxu0 %v2548_v15 }
 0x18a   : > { %3145 = vmatmul.mubr.f32.vlgmr.msra.gmra.mxu0 %v3828_v46  ;;  %3182 = vmatprep.subr.mxu0 %v3587_v3 }
 0x18b   : > { %3184 = vmatprep.mubr.msk.f32.mxu0 %vm3588_vm0, %v3587_v3 }
 0x20a   : > { %v392_v17 = vpop.f32.mrf.mxu0  ;;  %v487_v18 = vpop.f32.mrf.mxu1 }
 0x20b   : > { %v488_v20 = vadd.f32 %v2508_v16, %v487_v18  ;;  %v393_v23 = vadd.f32 %v2490_v19, %v392_v17  ;;  %v2626_v18 = vld [vmem:[%s4702_s3 + $0x378] sm:$0xff] }
 0x20c   : > { %v2996_v21 = vpop.f32.mrf.mxu0  ;;  %v3031_v22 = vpop.f32.mrf.mxu1 }
 0x20d   : > { %3068 = vmatpush3.xpose.msk.msra.mxu1 %vm586_vm1, %v488_v20  ;;  %v2625_v20 = vld [vmem:[%s4702_s3 + $0x370] sm:$0xff]  ;;  %v2624_v21 = vld [vmem:[%s4702_s3 + $0x368] sm:$0xff]  ;;  %v2623_v22 = vld [vmem:[%s4702_s3 + $0x360] sm:$0xff] }
 0x20e   : > { %3072 = vmatprep.subr.mxu1 %v3587_v3 }
 0x210   : > { %3070 = vmatmul.mubr.msk.f32.vlgmr.msra.gmra.mxu1 %vm586_vm1, %v393_v23  ;;  %v2622_v23 = vld [vmem:[%s4702_s3 + $0x358] sm:$0xff] }
 0x211   : > { %3074 = vmatprep.mubr.msk.f32.mxu1 %vm3588_vm0, %v3587_v3 }
 0x22a   : > { %v582_v25 = vpop.f32.mrf.mxu0 }
 0x22b   : > { %v583_v26 = vadd.f32 %v2526_v24, %v582_v25  ;;  %v2621_v24 = vld [vmem:[%s4702_s3 + $0x350] sm:$0xff]  ;;  %v2620_v25 = vld [vmem:[%s4702_s3 + $0x348] sm:$0xff] }
 0x22c   : > { %v3066_v27 = vpop.f32.mrf.mxu0 }
 0x22d   : > { %3073 = vmatpush3.msra.mxu1 %v583_v26  ;;  %v2619_v26 = vld [vmem:[%s4702_s3 + $0x340] sm:$0xff]  ;;  %v2618_v27 = vld [vmem:[%s4702_s3 + $0x338] sm:$0xff] }
 0x22e   : > { %3077 = vmatprep.subr.mxu1 %v3587_v3 }
 0x24a   : > { %v939_v29 = vpop.f32.mrf.mxu0 }
 0x24b   : > { %v940_v30 = vadd.f32 %v2565_v28, %v939_v29  ;;  %v2617_v28 = vld [vmem:[%s4702_s3 + $0x330] sm:$0xff]  ;;  %v2616_v29 = vld [vmem:[%s4702_s3 + $0x328] sm:$0xff] }
 0x24c   : > { %v3146_v31 = vpop.f32.mrf.mxu0 }
 0x24d   : > { %3183 = vmatpush3.xpose.msk.msra.mxu0 %vm586_vm1, %v940_v30  ;;  %v2615_v30 = vld [vmem:[%s4702_s3 + $0x320] sm:$0xff]  ;;  %v2614_v31 = vld [vmem:[%s4702_s3 + $0x318] sm:$0xff] }
 0x24e   : > { %3187 = vmatprep.subr.mxu0 %v3587_v3 }
 0x2d0   : > { %v659_v32 = vpop.f32.mrf.mxu1 }
 0x2d1   : > { %v664_v33 = vsel %vm663_vm2, %v659_v32, -inf }
 0x2d2   : > { %665 = vmax.xlane.f32.xlu1 %v664_v33  ;;  %v3071_v34 = vpop.f32.mrf.mxu1  ;;  %v2612_v33 = vld [vmem:[%s4702_s3 + $0x308] sm:$0xff] }
 0x2d3   : > { %v2547_v34 = vld [vmem:[%s4703_s4 + $0x1] ss:$0 sm:$0xff] }
 0x35b   : > { %v666_v35 = vpop.xlane.xlu1 %665 }
 0x35c   : > { %v667_v36 = vsub.f32 %v659_v32, %v666_v35  ;;  %v2613_v32 = vld [vmem:[%s4702_s3 + $0x310] sm:$0xff]  ;;  %v2611_v35 = vld [vmem:[%s4702_s3 + $0x300] sm:$0xff] }
 0x35e   : > { %v668_v37 = vmul.f32 1.442695, %v667_v36 }
 0x360   : > { %3509 = vpow2.f32 %v668_v37 }
 0x36d   : > { %v3510_v39 = vpop.eup %3509 }
 0x36e   : > { %3075 = vmatmul.mubr.msk.f32.vlgmr.msra.gmra.mxu1 %vm663_vm2, %v3510_v39  ;;  %v670_v40 = vsel %vm663_vm2, %v3510_v39, 0.0  ;;  %v2583_v39 = vld [vmem:[%s4703_s4 + $0x9] ss:$0 sm:$0xff] }
 0x36f   : > { %3078 = vmatpush3.msra.mxu1 %v2545_v38  ;;  %671 = vadd.xlane.f32.xlu0 %v670_v40 }
 0x370   : > { %3079 = vmatprep.subr.mxu1 %v3587_v3  ;;  %3109 = vmatprep.mubr.msk.f32.mxu1 %vm3588_vm0, %v3587_v3 }
 0x371   : > { %3080 = vmatpush3.msra.mxu1 %v2544_v41 }
 0x372   : > { %3081 = vmatprep.subr.mxu1 %v3587_v3 }
 0x373   : > { %3082 = vmatpush3.msra.mxu1 %v2543_v42 }
 0x374   : > { %3083 = vmatprep.subr.mxu1 %v3587_v3 }
 0x375   : > { %3084 = vmatpush3.msra.mxu1 %v2542_v43 }
 0x376   : > { %3085 = vmatprep.subr.mxu1 %v3587_v3 }
 0x377   : > { %3086 = vmatpush3.msra.mxu1 %v2541_v44 }
 0x378   : > { %3087 = vmatprep.subr.mxu1 %v3587_v3 }
 0x379   : > { %3088 = vmatpush3.msra.mxu1 %v2540_v45  ;;  %v2628_v45 = vld [vmem:[%s4703_s4 + $0x6] ss:$0 sm:$0xff] }
 0x37a   : > { %3089 = vmatprep.subr.mxu1 %v3587_v3 }
 0x37b   : > { %3090 = vmatpush3.msra.mxu1 %v2539_v47 }
 0x37c   : > { %3091 = vmatprep.subr.mxu1 %v3587_v3 }
 0x37d   : > { %3092 = vmatpush3.msra.mxu1 %v2538_v48 }
 0x37e   : > { %3093 = vmatprep.subr.mxu1 %v3587_v3 }
 0x37f   : > { %3094 = vmatpush3.msra.mxu1 %v2537_v49 }
 0x380   : > { %3095 = vmatprep.subr.mxu1 %v3587_v3 }
 0x381   : > { %3096 = vmatpush3.msra.mxu1 %v2536_v50 }
 0x382   : > { %3097 = vmatprep.subr.mxu1 %v3587_v3 }
 0x383   : > { %3098 = vmatpush3.msra.mxu1 %v2535_v51 }
 0x384   : > { %3099 = vmatprep.subr.mxu1 %v3587_v3 }
 0x385   : > { %3100 = vmatpush3.msra.mxu1 %v2534_v52 }
 0x386   : > { %3101 = vmatprep.subr.mxu1 %v3587_v3 }
 0x387   : > { %3102 = vmatpush3.msra.mxu1 %v2533_v53 }
 0x388   : > { %3103 = vmatprep.subr.mxu1 %v3587_v3 }
 0x389   : > { %3104 = vmatpush3.msra.mxu1 %v2532_v54 }
 0x38a   : > { %3105 = vmatprep.subr.mxu1 %v3587_v3 }
 0x38b   : > { %3106 = vmatpush3.msra.mxu1 %v2531_v55 }
 0x38c   : > { %3107 = vmatprep.subr.mxu1 %v3587_v3 }
 0x38d   : > { %3108 = vmatpush3.msra.mxu1 %v2530_v56 }
 0x38e   : > { %3110 = vmatmul.mubr.f32.vlgmr.msra.gmra.mxu1 %v3828_v46  ;;  %3147 = vmatprep.subr.mxu1 %v3587_v3 }
 0x38f   : > { %3148 = vmatpush3.msra.mxu1 %v2581_v57  ;;  %3179 = vmatprep.mubr.msk.f32.mxu1 %vm3588_vm0, %v3587_v3 }
 0x390   : > { %3149 = vmatprep.subr.mxu1 %v3587_v3 }
 0x391   : > { %3150 = vmatpush3.msra.mxu1 %v2580_v58  ;;  %v2590_v58 = vld [vmem:[%s4704_s5 + $0x38] sm:$0xff] }
 0x392   : > { %3151 = vmatprep.subr.mxu1 %v3587_v3 }
 0x393   : > { %3152 = vmatpush3.msra.mxu1 %v2579_v59  ;;  %v2589_v59 = vld [vmem:[%s4704_s5 + $0x30] sm:$0xff] }
 0x394   : > { %3153 = vmatprep.subr.mxu1 %v3587_v3 }
 0x395   : > { %3154 = vmatpush3.msra.mxu1 %v2578_v60  ;;  %v2588_v60 = vld [vmem:[%s4704_s5 + $0x28] sm:$0xff] }
 0x396   : > { %3155 = vmatprep.subr.mxu1 %v3587_v3 }
 0x397   : > { %3156 = vmatpush3.msra.mxu1 %v2577_v61  ;;  %v2587_v61 = vld [vmem:[%s4704_s5 + $0x20] sm:$0xff] }
 0x398   : > { %3157 = vmatprep.subr.mxu1 %v3587_v3 }
 0x399   : > { %3158 = vmatpush3.msra.mxu1 %v2576_v62 }
 0x39a   : > { %3159 = vmatprep.subr.mxu1 %v3587_v3 }
 0x39b   : > { %3160 = vmatpush3.msra.mxu1 %v2575_v63 }
 0x39c   : > { %3161 = vmatprep.subr.mxu1 %v3587_v3 }
 0x39d   : > { %3162 = vmatpush3.msra.mxu1 %v2574_v0 }
 0x39e   : > { %3163 = vmatprep.subr.mxu1 %v3587_v3 }
 0x39f   : > { %3164 = vmatpush3.msra.mxu1 %v2573_v1 }
 0x3a0   : > { %3165 = vmatprep.subr.mxu1 %v3587_v3 }
 0x3a1   : > { %3166 = vmatpush3.msra.mxu1 %v2572_v2  ;;  %v2608_v2 = vld [vmem:[%s4702_s3 + $0x178] sm:$0xff] }
 0x3a2   : > { %3167 = vmatprep.subr.mxu1 %v3587_v3 }
 0x3a3   : > { %3168 = vmatpush3.msra.mxu1 %v2571_v4 }
 0x3a4   : > { %3169 = vmatprep.subr.mxu1 %v3587_v3 }
 0x3a5   : > { %3170 = vmatpush3.msra.mxu1 %v2570_v5  ;;  %v2607_v5 = vld [vmem:[%s4702_s3 + $0x170] sm:$0xff] }
 0x3a6   : > { %3171 = vmatprep.subr.mxu1 %v3587_v3 }
 0x3a7   : > { %3172 = vmatpush3.msra.mxu1 %v2569_v6  ;;  %v2606_v6 = vld [vmem:[%s4702_s3 + $0x168] sm:$0xff] }
 0x3a8   : > { %3173 = vmatprep.subr.mxu1 %v3587_v3 }
 0x3a9   : > { %3174 = vmatpush3.msra.mxu1 %v2568_v7  ;;  %v2605_v7 = vld [vmem:[%s4702_s3 + $0x160] sm:$0xff] }
 0x3aa   : > { %3175 = vmatprep.subr.mxu1 %v3587_v3 }
 0x3ab   : > { %3176 = vmatpush3.msra.mxu1 %v2567_v8  ;;  %v2604_v8 = vld [vmem:[%s4702_s3 + $0x158] sm:$0xff] }
 0x3ac   : > { %3177 = vmatprep.subr.mxu1 %v3587_v3 }
 0x3ad   : > { %3178 = vmatpush3.msra.mxu1 %v2566_v9  ;;  %v2603_v9 = vld [vmem:[%s4702_s3 + $0x150] sm:$0xff] }
 0x3ae   : > { %3180 = vmatmul.mubr.f32.vlgmr.msra.gmra.mxu1 %v3828_v46  ;;  %3203 = vmatprep.subr.mxu1 %v3587_v3 }
 0x3af   : > { %3204 = vmatpush3.msra.mxu1 %v752_v10  ;;  %3211 = vmatprep.mubr.msk.f32.mxu1 %vm3588_vm0, %v3587_v3  ;;  %v2602_v10 = vld [vmem:[%s4702_s3 + $0x148] sm:$0xff] }
 0x3b0   : > { %3205 = vmatprep.subr.mxu1 %v3587_v3 }
 0x3b1   : > { %3206 = vmatpush3.msra.mxu1 %v751_v11  ;;  %v2601_v11 = vld [vmem:[%s4702_s3 + $0x140] sm:$0xff] }
 0x3b2   : > { %3207 = vmatprep.subr.mxu1 %v3587_v3 }
 0x3b3   : > { %3208 = vmatpush3.msra.mxu1 %v750_v12  ;;  %v2600_v12 = vld [vmem:[%s4702_s3 + $0x138] sm:$0xff] }
 0x3b4   : > { %3209 = vmatprep.subr.mxu1 %v3587_v3 }
 0x3b5   : > { %3210 = vmatpush3.msra.mxu1 %v749_v13  ;;  %v2599_v13 = vld [vmem:[%s4702_s3 + $0x130] sm:$0xff] }
 0x3b6   : > { %3249 = vmatprep.subr.mxu1 %v3587_v3 }
 0x3f8   : > { %v672_v14 = vpop.xlane.xlu0 %671 }
 0x3f9   : > { %3511 = vrcp.f32 %v672_v14  ;;  %v2598_v14 = vld [vmem:[%s4702_s3 + $0x128] sm:$0xff] }
 0x406   : > { %v3512_v15 = vpop.eup %3511 }
 0x42e   : > { %v742_v16 = vpop.f32.mrf.mxu1 }
 0x42f   : > { %v748_v17 = vmul.f32 %v3512_v15, %v742_v16  ;;  %v2597_v15 = vld [vmem:[%s4702_s3 + $0x120] sm:$0xff]  ;;  %v2596_v16 = vld [vmem:[%s4702_s3 + $0x118] sm:$0xff] }
 0x430   : > { %v3076_v19 = vpop.f32.mrf.mxu1 }
 0x431   : > { %3212 = vmatmul.mubr.msk.f32.vlgmr.msra.gmra.mxu1 %vm586_vm1, %v748_v17  ;;  %v2595_v17 = vld [vmem:[%s4702_s3 + $0x110] sm:$0xff]  ;;  %v2593_v19 = vld [vmem:[%s4702_s3 + $0x100] sm:$0xff] }
 0x432   : > { %3250 = vmatpush3.msra.mxu1 %v2626_v18  ;;  %3281 = vmatprep.mubr.msk.f32.mxu1 %vm3588_vm0, %v3587_v3  ;;  %v2594_v18 = vld [vmem:[%s4702_s3 + $0x108] sm:$0xff] }
 0x433   : > { %3251 = vmatprep.subr.mxu1 %v3587_v3 }
 0x434   : > { %3252 = vmatpush3.msra.mxu1 %v2625_v20  ;;  %v2644_v20 = vld [vmem:[%s4702_s3 + $0x578] sm:$0xff] }
 0x435   : > { %3253 = vmatprep.subr.mxu1 %v3587_v3 }
 0x436   : > { %3254 = vmatpush3.msra.mxu1 %v2624_v21  ;;  %v2643_v21 = vld [vmem:[%s4702_s3 + $0x570] sm:$0xff] }
 0x437   : > { %3255 = vmatprep.subr.mxu1 %v3587_v3 }
 0x438   : > { %3256 = vmatpush3.msra.mxu1 %v2623_v22  ;;  %v2642_v22 = vld [vmem:[%s4702_s3 + $0x568] sm:$0xff] }
 0x439   : > { %3257 = vmatprep.subr.mxu1 %v3587_v3 }
 0x43a   : > { %3258 = vmatpush3.msra.mxu1 %v2622_v23  ;;  %v2641_v23 = vld [vmem:[%s4702_s3 + $0x560] sm:$0xff] }
 0x43b   : > { %3259 = vmatprep.subr.mxu1 %v3587_v3 }
 0x43c   : > { %3260 = vmatpush3.msra.mxu1 %v2621_v24  ;;  %v2640_v24 = vld [vmem:[%s4702_s3 + $0x558] sm:$0xff] }
 0x43d   : > { %3261 = vmatprep.subr.mxu1 %v3587_v3 }
 0x43e   : > { %3262 = vmatpush3.msra.mxu1 %v2620_v25  ;;  %v2639_v25 = vld [vmem:[%s4702_s3 + $0x550] sm:$0xff] }
 0x43f   : > { %3263 = vmatprep.subr.mxu1 %v3587_v3 }
 0x440   : > { %3264 = vmatpush3.msra.mxu1 %v2619_v26  ;;  %v2638_v26 = vld [vmem:[%s4702_s3 + $0x548] sm:$0xff] }
 0x441   : > { %3265 = vmatprep.subr.mxu1 %v3587_v3 }
 0x442   : > { %3266 = vmatpush3.msra.mxu1 %v2618_v27  ;;  %v2637_v27 = vld [vmem:[%s4702_s3 + $0x540] sm:$0xff] }
 0x443   : > { %3267 = vmatprep.subr.mxu1 %v3587_v3 }
 0x444   : > { %3268 = vmatpush3.msra.mxu1 %v2617_v28  ;;  %v2636_v28 = vld [vmem:[%s4702_s3 + $0x538] sm:$0xff] }
 0x445   : > { %3269 = vmatprep.subr.mxu1 %v3587_v3 }
 0x446   : > { %3270 = vmatpush3.msra.mxu1 %v2616_v29  ;;  %v2635_v29 = vld [vmem:[%s4702_s3 + $0x530] sm:$0xff] }
 0x447   : > { %3271 = vmatprep.subr.mxu1 %v3587_v3 }
 0x448   : > { %3272 = vmatpush3.msra.mxu1 %v2615_v30  ;;  %v2634_v30 = vld [vmem:[%s4702_s3 + $0x528] sm:$0xff] }
 0x449   : > { %3273 = vmatprep.subr.mxu1 %v3587_v3 }
 0x44a   : > { %3274 = vmatpush3.msra.mxu1 %v2614_v31  ;;  %v2633_v31 = vld [vmem:[%s4702_s3 + $0x520] sm:$0xff] }
 0x44b   : > { %3275 = vmatprep.subr.mxu1 %v3587_v3 }
 0x44c   : > { %3276 = vmatpush3.msra.mxu1 %v2613_v32  ;;  %v2632_v32 = vld [vmem:[%s4702_s3 + $0x518] sm:$0xff] }
 0x44d   : > { %3277 = vmatprep.subr.mxu1 %v3587_v3 }
 0x44e   : > { %v844_v36 = vpop.f32.mrf.mxu1  ;;  %3278 = vmatpush3.msra.mxu1 %v2612_v33  ;;  %v2631_v33 = vld [vmem:[%s4702_s3 + $0x510] sm:$0xff] }
 0x44f   : > { %v845_v37 = vadd.f32 %v2547_v34, %v844_v36  ;;  %3279 = vmatprep.subr.mxu1 %v3587_v3  ;;  %v2630_v34 = vld [vmem:[%s4702_s3 + $0x508] sm:$0xff]  ;;  %v2688_v36 = vld [vmem:[%s4702_s3 + $0x3f8] sm:$0xff] }
 0x450   : > { %v3111_v38 = vpop.f32.mrf.mxu1  ;;  %3280 = vmatpush3.msra.mxu1 %v2611_v35  ;;  %v2629_v35 = vld [vmem:[%s4702_s3 + $0x500] sm:$0xff] }
 0x451   : > { %3185 = vmatmul.mubr.msk.f32.vlgmr.msra.gmra.mxu0 %vm586_vm1, %v845_v37  ;;  %3282 = vmatmul.mubr.f32.vlgmr.msra.gmra.mxu1 %v3828_v46  ;;  %v2687_v37 = vld [vmem:[%s4702_s3 + $0x3f0] sm:$0xff]  ;;  %v2686_v38 = vld [vmem:[%s4702_s3 + $0x3e8] sm:$0xff] }
 0x452   : > { %3319 = vmatprep.subr.mxu1 %v3587_v3  ;;  %3189 = vmatprep.mubr.msk.f32.mxu0 %vm3588_vm0, %v3587_v3 }
 0x453   : > { %3321 = vmatprep.mubr.msk.f32.mxu1 %vm3588_vm0, %v3587_v3 }
 0x46e   : > { %v1034_v40 = vpop.f32.mrf.mxu1 }
 0x46f   : > { %v1035_v41 = vadd.f32 %v2583_v39, %v1034_v40  ;;  %v2685_v39 = vld [vmem:[%s4702_s3 + $0x3e0] sm:$0xff]  ;;  %v2684_v40 = vld [vmem:[%s4702_s3 + $0x3d8] sm:$0xff] }
 0x470   : > { %v3181_v42 = vpop.f32.mrf.mxu1 }
 0x471   : > { %3188 = vmatpush3.msra.mxu0 %v1035_v41  ;;  %v2683_v41 = vld [vmem:[%s4702_s3 + $0x3d0] sm:$0xff]  ;;  %v2682_v42 = vld [vmem:[%s4702_s3 + $0x3c8] sm:$0xff] }
 0x472   : > { %3192 = vmatprep.subr.mxu0 %v3587_v3 }
 0x4f1   : > { %v4225_v43 = vpop.f32.mrf.mxu1 }
 0x4f3   : > { %v3213_v44 = vpop.f32.mrf.mxu1 }
 0x4f4   : > { %v2681_v44 = vld [vmem:[%s4702_s3 + $0x3c0] sm:$0xff] }
 0x511   : > { %v1110_v47 = vpop.f32.mrf.mxu0  ;;  %v1536_v48 = vpop.f32.mrf.mxu1 }
 0x512   : > { %v1537_v49 = vadd.f32 %v2628_v45, %v1536_v48  ;;  %v1114_v50 = vsel %vm663_vm2, %v1110_v47, -inf  ;;  %v2680_v45 = vld [vmem:[%s4702_s3 + $0x3b8] sm:$0xff]  ;;  %v2678_v48 = vld [vmem:[%s4702_s3 + $0x3a8] sm:$0xff] }
 0x513   : > { %v3283_v51 = vpop.f32.mrf.mxu1  ;;  %1115 = vmax.xlane.f32.xlu1 %v1114_v50  ;;  %v3186_v52 = vpop.f32.mrf.mxu0  ;;  %v2676_v50 = vld [vmem:[%s4702_s3 + $0x398] sm:$0xff] }
 0x514   : > { %3320 = vmatpush3.xpose.msk.msra.mxu1 %vm586_vm1, %v1537_v49  ;;  %v2677_v49 = vld [vmem:[%s4702_s3 + $0x3a0] sm:$0xff]  ;;  %v2675_v51 = vld [vmem:[%s4702_s3 + $0x390] sm:$0xff]  ;;  %v2674_v52 = vld [vmem:[%s4702_s3 + $0x388] sm:$0xff] }
 0x515   : > { %3324 = vmatprep.subr.mxu1 %v3587_v3 }
 0x59c   : > { %v1116_v53 = vpop.xlane.xlu1 %1115 }
 0x59d   : > { %v1117_v54 = vsub.f32 %v1110_v47, %v1116_v53  ;;  %v2679_v47 = vld [vmem:[%s4702_s3 + $0x3b0] sm:$0xff]  ;;  %v2673_v53 = vld [vmem:[%s4702_s3 + $0x380] sm:$0xff] }
 0x59f   : > { %v1118_v55 = vmul.f32 1.442695, %v1117_v54 }
 0x5a1   : > { %3513 = vpow2.f32 %v1118_v55 }
 0x5ae   : > { %v3514_v56 = vpop.eup %3513 }
 0x5af   : > { %3190 = vmatmul.mubr.msk.f32.vlgmr.msra.gmra.mxu0 %vm663_vm2, %v3514_v56  ;;  %v1120_v57 = vsel %vm663_vm2, %v3514_v56, 0.0  ;;  %v2610_v56 = vld [vmem:[%s4703_s4 + $0x2] ss:$0 sm:$0xff] }
 0x5b0   : > { %1121 = vadd.xlane.f32.xlu1 %v1120_v57  ;;  %3200 = vmatprep.mubr.msk.f32.mxu0 %vm3588_vm0, %v3587_v3 }
 0x5b1   : > { %3193 = vmatpush3.msra.mxu0 %v2590_v58 }
 0x5b2   : > { %3194 = vmatprep.subr.mxu0 %v3587_v3 }
 0x5b3   : > { %3195 = vmatpush3.msra.mxu0 %v2589_v59 }
 0x5b4   : > { %3196 = vmatprep.subr.mxu0 %v3587_v3 }
 0x5b5   : > { %3197 = vmatpush3.msra.mxu0 %v2588_v60  ;;  %v2646_v60 = vld [vmem:[%s4703_s4 + $0xa] ss:$0 sm:$0xff] }
 0x5b6   : > { %3198 = vmatprep.subr.mxu0 %v3587_v3 }
 0x5b7   : > { %3199 = vmatpush3.msra.mxu0 %v2587_v61 }
 0x5b8   : > { %3214 = vmatprep.subr.mxu0 %v3587_v3 }
 0x639   : > { %v1122_v62 = vpop.xlane.xlu1 %1121 }
 0x63a   : > { %3515 = vrcp.f32 %v1122_v62 }
 0x647   : > { %v3516_v63 = vpop.eup %3515 }
 0x66f   : > { %v1192_v0 = vpop.f32.mrf.mxu0 }
 0x670   : > { %v1198_v1 = vmul.f32 %v3516_v63, %v1192_v0  ;;  %v2690_v0 = vld [vmem:[%s4703_s4 + $0x7] ss:$0 sm:$0xff] }
 0x671   : > { %v3191_v4 = vpop.f32.mrf.mxu0 }
 0x672   : > { %3201 = vmatmul.mubr.msk.f32.vlgmr.msra.gmra.mxu0 %vm586_vm1, %v1198_v1 }
 0x673   : > { %3215 = vmatpush3.msra.mxu0 %v2608_v2  ;;  %3246 = vmatprep.mubr.msk.f32.mxu0 %vm3588_vm0, %v3587_v3 }
 0x674   : > { %3216 = vmatprep.subr.mxu0 %v3587_v3 }
 0x675   : > { %3217 = vmatpush3.msra.mxu0 %v2607_v5 }
 0x676   : > { %3218 = vmatprep.subr.mxu0 %v3587_v3 }
 0x677   : > { %3219 = vmatpush3.msra.mxu0 %v2606_v6 }
 0x678   : > { %3220 = vmatprep.subr.mxu0 %v3587_v3 }
 0x679   : > { %3221 = vmatpush3.msra.mxu0 %v2605_v7 }
 0x67a   : > { %3222 = vmatprep.subr.mxu0 %v3587_v3 }
 0x67b   : > { %3223 = vmatpush3.msra.mxu0 %v2604_v8 }
 0x67c   : > { %3224 = vmatprep.subr.mxu0 %v3587_v3 }
 0x67d   : > { %3225 = vmatpush3.msra.mxu0 %v2603_v9 }
 0x67e   : > { %3226 = vmatprep.subr.mxu0 %v3587_v3 }
 0x67f   : > { %3227 = vmatpush3.msra.mxu0 %v2602_v10 }
 0x680   : > { %3228 = vmatprep.subr.mxu0 %v3587_v3 }
 0x681   : > { %3229 = vmatpush3.msra.mxu0 %v2601_v11 }
 0x682   : > { %3230 = vmatprep.subr.mxu0 %v3587_v3 }
 0x683   : > { %3231 = vmatpush3.msra.mxu0 %v2600_v12 }
 0x684   : > { %3232 = vmatprep.subr.mxu0 %v3587_v3 }
 0x685   : > { %3233 = vmatpush3.msra.mxu0 %v2599_v13  ;;  %v2653_v13 = vld [vmem:[%s4704_s5 + $0x58] sm:$0xff] }
 0x686   : > { %3234 = vmatprep.subr.mxu0 %v3587_v3 }
 0x687   : > { %3235 = vmatpush3.msra.mxu0 %v2598_v14  ;;  %v2652_v14 = vld [vmem:[%s4704_s5 + $0x50] sm:$0xff] }
 0x688   : > { %3236 = vmatprep.subr.mxu0 %v3587_v3 }
 0x689   : > { %3237 = vmatpush3.msra.mxu0 %v2597_v15  ;;  %v2651_v15 = vld [vmem:[%s4704_s5 + $0x48] sm:$0xff] }
 0x68a   : > { %3238 = vmatprep.subr.mxu0 %v3587_v3 }
 0x68b   : > { %3239 = vmatpush3.msra.mxu0 %v2596_v16  ;;  %v2650_v16 = vld [vmem:[%s4704_s5 + $0x40] sm:$0xff] }
 0x68c   : > { %3240 = vmatprep.subr.mxu0 %v3587_v3 }
 0x68d   : > { %3241 = vmatpush3.msra.mxu0 %v2595_v17 }
 0x68e   : > { %3242 = vmatprep.subr.mxu0 %v3587_v3 }
 0x68f   : > { %3243 = vmatpush3.msra.mxu0 %v2594_v18 }
 0x690   : > { %3244 = vmatprep.subr.mxu0 %v3587_v3 }
 0x691   : > { %3245 = vmatpush3.msra.mxu0 %v2593_v19 }
 0x692   : > { %3247 = vmatmul.mubr.f32.vlgmr.msra.gmra.mxu0 %v3828_v46  ;;  %3284 = vmatprep.subr.mxu0 %v3587_v3 }
 0x693   : > { %3285 = vmatpush3.msra.mxu0 %v2644_v20  ;;  %3316 = vmatprep.mubr.msk.f32.mxu0 %vm3588_vm0, %v3587_v3 }
 0x694   : > { %3286 = vmatprep.subr.mxu0 %v3587_v3 }
 0x695   : > { %3287 = vmatpush3.msra.mxu0 %v2643_v21  ;;  %v2670_v21 = vld [vmem:[%s4702_s3 + $0x1f8] sm:$0xff] }
 0x696   : > { %3288 = vmatprep.subr.mxu0 %v3587_v3 }
 0x697   : > { %3289 = vmatpush3.msra.mxu0 %v2642_v22 }
 0x698   : > { %3290 = vmatprep.subr.mxu0 %v3587_v3 }
 0x699   : > { %3291 = vmatpush3.msra.mxu0 %v2641_v23  ;;  %v2669_v23 = vld [vmem:[%s4702_s3 + $0x1f0] sm:$0xff] }
 0x69a   : > { %3292 = vmatprep.subr.mxu0 %v3587_v3 }
 0x69b   : > { %3293 = vmatpush3.msra.mxu0 %v2640_v24  ;;  %v2668_v24 = vld [vmem:[%s4702_s3 + $0x1e8] sm:$0xff] }
 0x69c   : > { %3294 = vmatprep.subr.mxu0 %v3587_v3 }
 0x69d   : > { %3295 = vmatpush3.msra.mxu0 %v2639_v25  ;;  %v2667_v25 = vld [vmem:[%s4702_s3 + $0x1e0] sm:$0xff] }
 0x69e   : > { %3296 = vmatprep.subr.mxu0 %v3587_v3 }
 0x69f   : > { %3297 = vmatpush3.msra.mxu0 %v2638_v26  ;;  %v2666_v26 = vld [vmem:[%s4702_s3 + $0x1d8] sm:$0xff] }
 0x6a0   : > { %3298 = vmatprep.subr.mxu0 %v3587_v3 }
 0x6a1   : > { %3299 = vmatpush3.msra.mxu0 %v2637_v27  ;;  %v2665_v27 = vld [vmem:[%s4702_s3 + $0x1d0] sm:$0xff] }
 0x6a2   : > { %3300 = vmatprep.subr.mxu0 %v3587_v3 }
 0x6a3   : > { %3301 = vmatpush3.msra.mxu0 %v2636_v28  ;;  %v2664_v28 = vld [vmem:[%s4702_s3 + $0x1c8] sm:$0xff] }
 0x6a4   : > { %3302 = vmatprep.subr.mxu0 %v3587_v3 }
 0x6a5   : > { %3303 = vmatpush3.msra.mxu0 %v2635_v29  ;;  %v2663_v29 = vld [vmem:[%s4702_s3 + $0x1c0] sm:$0xff] }
 0x6a6   : > { %3304 = vmatprep.subr.mxu0 %v3587_v3 }
 0x6a7   : > { %3305 = vmatpush3.msra.mxu0 %v2634_v30  ;;  %v2662_v30 = vld [vmem:[%s4702_s3 + $0x1b8] sm:$0xff] }
 0x6a8   : > { %3306 = vmatprep.subr.mxu0 %v3587_v3 }
 0x6a9   : > { %3307 = vmatpush3.msra.mxu0 %v2633_v31  ;;  %v2661_v31 = vld [vmem:[%s4702_s3 + $0x1b0] sm:$0xff] }
 0x6aa   : > { %3308 = vmatprep.subr.mxu0 %v3587_v3 }
 0x6ab   : > { %3309 = vmatpush3.msra.mxu0 %v2632_v32  ;;  %v2660_v32 = vld [vmem:[%s4702_s3 + $0x1a8] sm:$0xff] }
 0x6ac   : > { %3310 = vmatprep.subr.mxu0 %v3587_v3 }
 0x6ad   : > { %3311 = vmatpush3.msra.mxu0 %v2631_v33  ;;  %v2659_v33 = vld [vmem:[%s4702_s3 + $0x1a0] sm:$0xff] }
 0x6ae   : > { %3312 = vmatprep.subr.mxu0 %v3587_v3 }
 0x6af   : > { %3313 = vmatpush3.msra.mxu0 %v2630_v34  ;;  %v2658_v34 = vld [vmem:[%s4702_s3 + $0x198] sm:$0xff] }
 0x6b0   : > { %3314 = vmatprep.subr.mxu0 %v3587_v3 }
 0x6b1   : > { %3315 = vmatpush3.msra.mxu0 %v2629_v35  ;;  %v2657_v35 = vld [vmem:[%s4702_s3 + $0x190] sm:$0xff] }
 0x6b2   : > { %3317 = vmatmul.mubr.f32.vlgmr.msra.gmra.mxu0 %v3828_v46  ;;  %3375 = vmatprep.subr.mxu0 %v3587_v3 }
 0x6b3   : > { %3376 = vmatpush3.msra.mxu0 %v2688_v36  ;;  %3407 = vmatprep.mubr.msk.f32.mxu0 %vm3588_vm0, %v3587_v3  ;;  %v2656_v36 = vld [vmem:[%s4702_s3 + $0x188] sm:$0xff] }
 0x6b4   : > { %3377 = vmatprep.subr.mxu0 %v3587_v3 }
 0x6b5   : > { %3378 = vmatpush3.msra.mxu0 %v2687_v37  ;;  %v2655_v37 = vld [vmem:[%s4702_s3 + $0x180] sm:$0xff] }
 0x6b6   : > { %3379 = vmatprep.subr.mxu0 %v3587_v3 }
 0x6b7   : > { %3380 = vmatpush3.msra.mxu0 %v2686_v38  ;;  %v2706_v38 = vld [vmem:[%s4702_s3 + $0x5f8] sm:$0xff] }
 0x6b8   : > { %3381 = vmatprep.subr.mxu0 %v3587_v3 }
 0x6b9   : > { %3382 = vmatpush3.msra.mxu0 %v2685_v39  ;;  %v2705_v39 = vld [vmem:[%s4702_s3 + $0x5f0] sm:$0xff] }
 0x6ba   : > { %3383 = vmatprep.subr.mxu0 %v3587_v3 }
 0x6bb   : > { %3384 = vmatpush3.msra.mxu0 %v2684_v40  ;;  %v2704_v40 = vld [vmem:[%s4702_s3 + $0x5e8] sm:$0xff] }
 0x6bc   : > { %3385 = vmatprep.subr.mxu0 %v3587_v3 }
 0x6bd   : > { %3386 = vmatpush3.msra.mxu0 %v2683_v41  ;;  %v2703_v41 = vld [vmem:[%s4702_s3 + $0x5e0] sm:$0xff] }
 0x6be   : > { %3387 = vmatprep.subr.mxu0 %v3587_v3 }
 0x6bf   : > { %3388 = vmatpush3.msra.mxu0 %v2682_v42  ;;  %v2702_v42 = vld [vmem:[%s4702_s3 + $0x5d8] sm:$0xff] }
 0x6c0   : > { %3389 = vmatprep.subr.mxu0 %v3587_v3 }
 0x6c1   : > { %3390 = vmatpush3.msra.mxu0 %v2681_v44  ;;  %v2701_v44 = vld [vmem:[%s4702_s3 + $0x5d0] sm:$0xff] }
 0x6c2   : > { %3391 = vmatprep.subr.mxu0 %v3587_v3 }
 0x6c3   : > { %3392 = vmatpush3.msra.mxu0 %v2680_v45  ;;  %v2700_v45 = vld [vmem:[%s4702_s3 + $0x5c8] sm:$0xff] }
 0x6c4   : > { %3393 = vmatprep.subr.mxu0 %v3587_v3 }
 0x6c5   : > { %3394 = vmatpush3.msra.mxu0 %v2679_v47  ;;  %v2699_v47 = vld [vmem:[%s4702_s3 + $0x5c0] sm:$0xff] }
 0x6c6   : > { %3395 = vmatprep.subr.mxu0 %v3587_v3 }
 0x6c7   : > { %3396 = vmatpush3.msra.mxu0 %v2678_v48  ;;  %v2698_v48 = vld [vmem:[%s4702_s3 + $0x5b8] sm:$0xff] }
 0x6c8   : > { %3397 = vmatprep.subr.mxu0 %v3587_v3 }
 0x6c9   : > { %3398 = vmatpush3.msra.mxu0 %v2677_v49  ;;  %v2697_v49 = vld [vmem:[%s4702_s3 + $0x5b0] sm:$0xff] }
 0x6ca   : > { %3399 = vmatprep.subr.mxu0 %v3587_v3 }
 0x6cb   : > { %3400 = vmatpush3.msra.mxu0 %v2676_v50  ;;  %v2696_v50 = vld [vmem:[%s4702_s3 + $0x5a8] sm:$0xff] }
 0x6cc   : > { %3401 = vmatprep.subr.mxu0 %v3587_v3 }
 0x6cd   : > { %3402 = vmatpush3.msra.mxu0 %v2675_v51  ;;  %v2695_v51 = vld [vmem:[%s4702_s3 + $0x5a0] sm:$0xff] }
 0x6ce   : > { %3403 = vmatprep.subr.mxu0 %v3587_v3 }
 0x6cf   : > { %3404 = vmatpush3.msra.mxu0 %v2674_v52  ;;  %v2694_v52 = vld [vmem:[%s4702_s3 + $0x598] sm:$0xff] }
 0x6d0   : > { %3405 = vmatprep.subr.mxu0 %v3587_v3 }
 0x6d1   : > { %3406 = vmatpush3.msra.mxu0 %v2673_v53  ;;  %v2693_v53 = vld [vmem:[%s4702_s3 + $0x590] sm:$0xff] }
 0x6d2   : > { %3408 = vmatmul.mubr.f32.vlgmr.msra.gmra.mxu0 %v3828_v46  ;;  %3445 = vmatprep.subr.mxu0 %v3587_v3 }
 0x6d3   : > { %3447 = vmatprep.mubr.msk.f32.mxu0 %vm3588_vm0, %v3587_v3 }
 0x732   : > { %v4457_v54 = vpop.f32.mrf.mxu0 }
 0x734   : > { %v3202_v55 = vpop.f32.mrf.mxu0 }
 0x735   : > { %v2692_v55 = vld [vmem:[%s4702_s3 + $0x588] sm:$0xff] }
 0x752   : > { %v1441_v57 = vpop.f32.mrf.mxu0 }
 0x753   : > { %v1442_v58 = vadd.f32 %v2610_v56, %v1441_v57  ;;  %v2691_v56 = vld [vmem:[%s4702_s3 + $0x580] sm:$0xff]  ;;  %v1347_v57 = vadd.f32 %v4225_v43, %v4457_v54 }
 0x754   : > { %v3248_v59 = vpop.f32.mrf.mxu0 }
 0x755   : > { %3322 = vmatmul.mubr.msk.f32.vlgmr.msra.gmra.mxu1 %vm586_vm1, %v1442_v58 }
 0x756   : > { %3326 = vmatprep.mubr.msk.f32.mxu1 %vm3588_vm0, %v3587_v3 }
 0x772   : > { %v1631_v61 = vpop.f32.mrf.mxu0 }
 0x773   : > { %v1632_v62 = vadd.f32 %v2646_v60, %v1631_v61  ;;  %v2672_v61 = vld [vmem:[%s4703_s4 + $0x3] ss:$0 sm:$0xff] }
 0x774   : > { %v3318_v63 = vpop.f32.mrf.mxu0 }
 0x775   : > { %3325 = vmatpush3.msra.mxu1 %v1632_v62 }
 0x776   : > { %3329 = vmatprep.subr.mxu1 %v3587_v3 }
 0x792   : > { %v2061_v1 = vpop.f32.mrf.mxu0 }
 0x793   : > { %v2062_v2 = vadd.f32 %v2690_v0, %v2061_v1 }
 0x794   : > { %v3409_v4 = vpop.f32.mrf.mxu0 }
 0x795   : > { %3446 = vmatpush3.xpose.msk.msra.mxu0 %vm586_vm1, %v2062_v2 }
 0x796   : > { %3450 = vmatprep.subr.mxu0 %v3587_v3 }
 0x815   : > { %v1707_v5 = vpop.f32.mrf.mxu1 }
 0x816   : > { %v1711_v6 = vsel %vm663_vm2, %v1707_v5, -inf }
 0x817   : > { %1712 = vmax.xlane.f32.xlu0 %v1711_v6  ;;  %v3323_v7 = vpop.f32.mrf.mxu1 }
 0x8a0   : > { %v1713_v8 = vpop.xlane.xlu0 %1712 }
 0x8a1   : > { %v1714_v9 = vsub.f32 %v1707_v5, %v1713_v8 }
 0x8a3   : > { %v1715_v10 = vmul.f32 1.442695, %v1714_v9 }
 0x8a5   : > { %3517 = vpow2.f32 %v1715_v10 }
 0x8b2   : > { %v3518_v11 = vpop.eup %3517 }
 0x8b3   : > { %3327 = vmatmul.mubr.msk.f32.vlgmr.msra.gmra.mxu1 %vm663_vm2, %v3518_v11  ;;  %v1717_v12 = vsel %vm663_vm2, %v3518_v11, 0.0  ;;  %v2715_v11 = vld [vmem:[%s4704_s5 + $0x78] sm:$0xff] }
 0x8b4   : > { %1718 = vadd.xlane.f32.xlu1 %v1717_v12  ;;  %3337 = vmatprep.mubr.msk.f32.mxu1 %vm3588_vm0, %v3587_v3  ;;  %v2714_v12 = vld [vmem:[%s4704_s5 + $0x70] sm:$0xff] }
 0x8b5   : > { %3330 = vmatpush3.msra.mxu1 %v2653_v13  ;;  %v2713_v13 = vld [vmem:[%s4704_s5 + $0x68] sm:$0xff] }
 0x8b6   : > { %3331 = vmatprep.subr.mxu1 %v3587_v3 }
 0x8b7   : > { %3332 = vmatpush3.msra.mxu1 %v2652_v14  ;;  %v2712_v14 = vld [vmem:[%s4704_s5 + $0x60] sm:$0xff] }
 0x8b8   : > { %3333 = vmatprep.subr.mxu1 %v3587_v3 }
 0x8b9   : > { %3334 = vmatpush3.msra.mxu1 %v2651_v15 }
 0x8ba   : > { %3335 = vmatprep.subr.mxu1 %v3587_v3 }
 0x8bb   : > { %3336 = vmatpush3.msra.mxu1 %v2650_v16 }
 0x8bc   : > { %3340 = vmatprep.subr.mxu1 %v3587_v3 }
 0x93d   : > { %v1719_v17 = vpop.xlane.xlu1 %1718 }
 0x93e   : > { %3519 = vrcp.f32 %v1719_v17 }
 0x94b   : > { %v3520_v18 = vpop.eup %3519 }
 0x973   : > { %v1789_v19 = vpop.f32.mrf.mxu1 }
 0x974   : > { %v1795_v20 = vmul.f32 %v3520_v18, %v1789_v19 }
 0x975   : > { %v3328_v22 = vpop.f32.mrf.mxu1 }
 0x976   : > { %3338 = vmatmul.mubr.msk.f32.vlgmr.msra.gmra.mxu1 %vm586_vm1, %v1795_v20 }
 0x977   : > { %3341 = vmatpush3.msra.mxu1 %v2670_v21  ;;  %3372 = vmatprep.mubr.msk.f32.mxu1 %vm3588_vm0, %v3587_v3 }
 0x978   : > { %3342 = vmatprep.subr.mxu1 %v3587_v3 }
 0x979   : > { %3343 = vmatpush3.msra.mxu1 %v2669_v23 }
 0x97a   : > { %3344 = vmatprep.subr.mxu1 %v3587_v3 }
 0x97b   : > { %3345 = vmatpush3.msra.mxu1 %v2668_v24 }
 0x97c   : > { %3346 = vmatprep.subr.mxu1 %v3587_v3 }
 0x97d   : > { %3347 = vmatpush3.msra.mxu1 %v2667_v25 }
 0x97e   : > { %3348 = vmatprep.subr.mxu1 %v3587_v3 }
 0x97f   : > { %3349 = vmatpush3.msra.mxu1 %v2666_v26 }
 0x980   : > { %3350 = vmatprep.subr.mxu1 %v3587_v3 }
 0x981   : > { %3351 = vmatpush3.msra.mxu1 %v2665_v27 }
 0x982   : > { %3352 = vmatprep.subr.mxu1 %v3587_v3 }
 0x983   : > { %3353 = vmatpush3.msra.mxu1 %v2664_v28 }
 0x984   : > { %3354 = vmatprep.subr.mxu1 %v3587_v3 }
 0x985   : > { %3355 = vmatpush3.msra.mxu1 %v2663_v29 }
 0x986   : > { %3356 = vmatprep.subr.mxu1 %v3587_v3 }
 0x987   : > { %3357 = vmatpush3.msra.mxu1 %v2662_v30 }
 0x988   : > { %3358 = vmatprep.subr.mxu1 %v3587_v3 }
 0x989   : > { %3359 = vmatpush3.msra.mxu1 %v2661_v31 }
 0x98a   : > { %3360 = vmatprep.subr.mxu1 %v3587_v3 }
 0x98b   : > { %3361 = vmatpush3.msra.mxu1 %v2660_v32 }
 0x98c   : > { %3362 = vmatprep.subr.mxu1 %v3587_v3 }
 0x98d   : > { %3363 = vmatpush3.msra.mxu1 %v2659_v33 }
 0x98e   : > { %3364 = vmatprep.subr.mxu1 %v3587_v3 }
 0x98f   : > { %3365 = vmatpush3.msra.mxu1 %v2658_v34 }
 0x990   : > { %3366 = vmatprep.subr.mxu1 %v3587_v3 }
 0x991   : > { %3367 = vmatpush3.msra.mxu1 %v2657_v35 }
 0x992   : > { %3368 = vmatprep.subr.mxu1 %v3587_v3 }
 0x993   : > { %3369 = vmatpush3.msra.mxu1 %v2656_v36 }
 0x994   : > { %3370 = vmatprep.subr.mxu1 %v3587_v3 }
 0x995   : > { %3371 = vmatpush3.msra.mxu1 %v2655_v37 }
 0x996   : > { %3373 = vmatmul.mubr.f32.vlgmr.msra.gmra.mxu1 %v3828_v46  ;;  %3410 = vmatprep.subr.mxu1 %v3587_v3 }
 0x997   : > { %3411 = vmatpush3.msra.mxu1 %v2706_v38  ;;  %3442 = vmatprep.mubr.msk.f32.mxu1 %vm3588_vm0, %v3587_v3 }
 0x998   : > { %3412 = vmatprep.subr.mxu1 %v3587_v3 }
 0x999   : > { %3413 = vmatpush3.msra.mxu1 %v2705_v39 }
 0x99a   : > { %3414 = vmatprep.subr.mxu1 %v3587_v3 }
 0x99b   : > { %3415 = vmatpush3.msra.mxu1 %v2704_v40 }
 0x99c   : > { %3416 = vmatprep.subr.mxu1 %v3587_v3 }
 0x99d   : > { %3417 = vmatpush3.msra.mxu1 %v2703_v41 }
 0x99e   : > { %3418 = vmatprep.subr.mxu1 %v3587_v3 }
 0x99f   : > { %3419 = vmatpush3.msra.mxu1 %v2702_v42 }
 0x9a0   : > { %3420 = vmatprep.subr.mxu1 %v3587_v3 }
 0x9a1   : > { %3421 = vmatpush3.msra.mxu1 %v2701_v44 }
 0x9a2   : > { %3422 = vmatprep.subr.mxu1 %v3587_v3 }
 0x9a3   : > { %3423 = vmatpush3.msra.mxu1 %v2700_v45 }
 0x9a4   : > { %3424 = vmatprep.subr.mxu1 %v3587_v3 }
 0x9a5   : > { %3425 = vmatpush3.msra.mxu1 %v2699_v47 }
 0x9a6   : > { %3426 = vmatprep.subr.mxu1 %v3587_v3 }
 0x9a7   : > { %3427 = vmatpush3.msra.mxu1 %v2698_v48 }
 0x9a8   : > { %3428 = vmatprep.subr.mxu1 %v3587_v3 }
 0x9a9   : > { %3429 = vmatpush3.msra.mxu1 %v2697_v49 }
 0x9aa   : > { %3430 = vmatprep.subr.mxu1 %v3587_v3 }
 0x9ab   : > { %3431 = vmatpush3.msra.mxu1 %v2696_v50 }
 0x9ac   : > { %3432 = vmatprep.subr.mxu1 %v3587_v3 }
 0x9ad   : > { %3433 = vmatpush3.msra.mxu1 %v2695_v51 }
 0x9ae   : > { %3434 = vmatprep.subr.mxu1 %v3587_v3 }
 0x9af   : > { %3435 = vmatpush3.msra.mxu1 %v2694_v52 }
 0x9b0   : > { %3436 = vmatprep.subr.mxu1 %v3587_v3 }
 0x9b1   : > { %3437 = vmatpush3.msra.mxu1 %v2693_v53 }
 0x9b2   : > { %3438 = vmatprep.subr.mxu1 %v3587_v3 }
 0x9b3   : > { %3439 = vmatpush3.msra.mxu1 %v2692_v55 }
 0x9b4   : > { %3440 = vmatprep.subr.mxu1 %v3587_v3 }
 0x9b5   : > { %3441 = vmatpush3.msra.mxu1 %v2691_v56 }
 0x9b6   : > { %3443 = vmatmul.mubr.f32.vlgmr.msra.gmra.mxu1 %v3828_v46  ;;  %v2708_v46 = vld [vmem:[%s4703_s4 + $0xb] ss:$0 sm:$0xff] }
 0xa36   : > { %v1870_v58 = vpop.f32.mrf.mxu1 }
 0xa37   : > { %v1874_v59 = vadd.f32 %v1870_v58, %v1347_v57 }
 0xa38   : > { %v3339_v60 = vpop.f32.mrf.mxu1 }
 0xa56   : > { %v1966_v62 = vpop.f32.mrf.mxu1 }
 0xa57   : > { %v1967_v63 = vadd.f32 %v2672_v61, %v1966_v62 }
 0xa58   : > { %v3374_v0 = vpop.f32.mrf.mxu1 }
 0xa59   : > { %3448 = vmatmul.mubr.msk.f32.vlgmr.msra.gmra.mxu0 %vm586_vm1, %v1967_v63 }
 0xa5a   : > { %3452 = vmatprep.mubr.msk.f32.mxu0 %vm3588_vm0, %v3587_v3 }
 0xa76   : > { %v2156_v43 = vpop.f32.mrf.mxu1 }
 0xa77   : > { %v2157_v54 = vadd.f32 %v2708_v46, %v2156_v43 }
 0xa78   : > { %v3444_v1 = vpop.f32.mrf.mxu1 }
 0xa79   : > { %3451 = vmatpush3.msra.mxu0 %v2157_v54 }
 0xa7a   : > { %3455 = vmatprep.subr.mxu0 %v3587_v3 }
 0xb19   : > { %v2232_v2 = vpop.f32.mrf.mxu0 }
 0xb1a   : > { %v2236_v4 = vsel %vm663_vm2, %v2232_v2, -inf }
 0xb1b   : > { %2237 = vmax.xlane.f32.xlu0 %v2236_v4  ;;  %v3449_v5 = vpop.f32.mrf.mxu0 }
 0xba4   : > { %v2238_v6 = vpop.xlane.xlu0 %2237 }
 0xba5   : > { %v2239_v7 = vsub.f32 %v2232_v2, %v2238_v6 }
 0xba7   : > { %v2240_v8 = vmul.f32 1.442695, %v2239_v7 }
 0xba9   : > { %3521 = vpow2.f32 %v2240_v8 }
 0xbb6   : > { %v3522_v9 = vpop.eup %3521 }
 0xbb7   : > { %3453 = vmatmul.mubr.msk.f32.vlgmr.msra.gmra.mxu0 %vm663_vm2, %v3522_v9  ;;  %v2242_v10 = vsel %vm663_vm2, %v3522_v9, 0.0 }
 0xbb8   : > { %2243 = vadd.xlane.f32.xlu1 %v2242_v10  ;;  %3463 = vmatprep.mubr.msk.f32.mxu0 %vm3588_vm0, %v3587_v3 }
 0xbb9   : > { %3456 = vmatpush3.msra.mxu0 %v2715_v11 }
 0xbba   : > { %3457 = vmatprep.subr.mxu0 %v3587_v3 }
 0xbbb   : > { %3458 = vmatpush3.msra.mxu0 %v2714_v12 }
 0xbbc   : > { %3459 = vmatprep.subr.mxu0 %v3587_v3 }
 0xbbd   : > { %3460 = vmatpush3.msra.mxu0 %v2713_v13 }
 0xbbe   : > { %3461 = vmatprep.subr.mxu0 %v3587_v3  ;;  %v2717_v3 = vld [vmem:[%s4705_s6] ss:$0 sm:$0xff] }
 0xbbf   : > { %3462 = vmatpush3.msra.mxu0 %v2712_v14 }
 0xc41   : > { %v2244_v15 = vpop.xlane.xlu1 %2243 }
 0xc42   : > { %3523 = vrcp.f32 %v2244_v15 }
 0xc4f   : > { %v3524_v16 = vpop.eup %3523 }
 0xc77   : > { %v2314_v17 = vpop.f32.mrf.mxu0 }
 0xc78   : > { %v2320_v18 = vmul.f32 %v3524_v16, %v2314_v17 }
 0xc79   : > { %v3454_v19 = vpop.f32.mrf.mxu0 }
 0xc7a   : > { %3464 = vmatmul.mubr.msk.f32.vlgmr.msra.gmra.mxu0 %vm586_vm1, %v2320_v18 }
 0xd3a   : > { %v2395_v20 = vpop.f32.mrf.mxu0 }
 0xd3b   : > { %v2399_v21 = vadd.f32 %v2395_v20, %v1874_v59 }
 0xd3c   : > { %v3465_v22 = vpop.f32.mrf.mxu0 }
 0xd3d   : > { %v2407_v23 = vadd.f32 %v2717_v3, %v2399_v21 }
 0xd3f   : > { %2408 = vst [vmem:[%s269_s19] sm:$0xff] %v2407_v23 }
 0xd40   : > { %3538 = shalt.err (!%p3535_p3)
}
 0xd41   : > { %s3539_s15 = scalar_lea.hbm %s2421_s23, 128  ;;  %s3543_s17 = scalar_lea.hbm %s4706_s7, 256 }
 0xd42   : > { %p3540_p4 = scmp.ne.s32.totalorder %s2421_s23, %s3539_s15  ;;  %p3544_p9 = scmp.lt.s32.totalorder %s2421_s23, %s4706_s7 }
 0xd43   : > { %p3545_p10 = scmp.lt.s32.totalorder %s3543_s17, %s3539_s15 }
 0xd44   : > { %p3541_p7 = pnand %p3540_p4, %p3668_p5 }
 0xd45   : > { %p3546_p11 = por %p3545_p10, %p3544_p9 }
 0xd46   : > { %p3542_p8 = pneg %p3541_p7 }
 0xd48   : > { %p3547_p12 = pnand %p3546_p11, %p3542_p8 }
 0xd4a   : > { %3550 = shalt.err (!%p3547_p12)
}
 0xd4b   : > { %3466 = dma.vmem_to_hbm [thread:$0]  (%p3668_p5), %s2424_s20, 128, %s2421_s23, %s2410_s29  }
 0xd4c PF: > { %p3472_p13 = scmp.ge.s32.totalorder %s3585_s27, 2  ;;  %s2435_s21 = sand.u32 1, %s3573_s24  }
 0xd4d   : > { %s2436_s22 = scalar_lea.sflag [#allocation3], %s2435_s21 }
 0xd4e   : > { %p3469_p0 = pnand %p3472_p13, %p3672_p6 }
 0xd50   : > { %p3470_p1 = pneg %p3469_p0 }
 0xd52   : > { %3568 = dma.done.wait (%p3470_p1), %s2436_s22, 128  }
 0xd53   : > { %3570 = vsyncadd (%p3470_p1), %s2436_s22, 4294967168  ;;  %p17_p2 = scmp.ge.s32.totalorder %s3655_s30, 4   ;;  %s4709_s24 = smov %s3577_s25 }
 0xd54   : > { %s4710_s25 = smov %s3581_s26  ;;  %s4711_s26 = smov %s3666_s10 }
 0xd55   : > { %s4712_s27 = smov %s3655_s30  ;;  %19 = sbr.rel (!%p17_p2) target bundleno = 3 (0x3), region = 108 }
 0xd5a   :  { %2441 = vsyncpa [#allocation3], 1 }
 0xd5b   :  { %2443 = vsyncpa [#allocation3 + $0x1], 1 }

</bundles_post_ra>
